<compile_context>
chip_gen: v7x
topology: tpu7x:2x2x1
jax: 0.10.0
libtpu: 0.0.40
codegen_flags: <defaults>
</compile_context>

<pallas_src>
import math
import jax
import jax.numpy as jnp
from jax.experimental import pallas as pl
from jax.experimental.pallas import tpu as pltpu

STD_MAX_NOISE = 1.0
HIDDEN = 512


def _softplus(z):
    # numerically stable softplus using only basic VPU/EUP ops
    return jnp.maximum(z, 0.0) + jnp.log1p(jnp.exp(-jnp.abs(z)))


def _make_policy_kernel(act_limit, actions):
    log2pi = math.log(2.0 * math.pi)
    ln2 = math.log(2.0)
    A = actions

    def kernel(x_ref, w1_ref, b1_ref, w2_ref, b2_ref, w3_ref, b3_ref,
               wh_ref, bh_ref, noise_ref, out_ref):
        bf16 = jnp.bfloat16
        f32 = jnp.float32

        # Three hidden layers: bf16 operands into the MXU, f32 accumulate, f32 VPU math.
        h = jnp.dot(x_ref[...].astype(bf16), w1_ref[...],
                    preferred_element_type=f32) + b1_ref[...]
        h = jnp.maximum(h, 0.0)
        h = jnp.dot(h.astype(bf16), w2_ref[...],
                    preferred_element_type=f32) + b2_ref[...]
        h = jnp.maximum(h, 0.0)
        h = jnp.dot(h.astype(bf16), w3_ref[...],
                    preferred_element_type=f32) + b3_ref[...]
        h = jnp.maximum(h, 0.0)

        # Fused mean/logstd head: one (TB,512) x (512,2A) matmul, slice the halves.
        head = jnp.dot(h.astype(bf16), wh_ref[...],
                       preferred_element_type=f32) + bh_ref[...]
        mean_pre = head[:, :A]
        logstd_pre = head[:, A:]

        mean = jnp.tanh(mean_pre)
        # sigmoid with the divide on the (otherwise idle) EUP slot.
        sig = pl.reciprocal(1.0 + jnp.exp(-logstd_pre), approx=True)
        std = 0.1 + (STD_MAX_NOISE - 0.1) * sig

        eps = noise_ref[...]
        pi_action = mean + std * eps                      # Normal(mean, std).rsample()

        # Normal(mean, std).log_prob(pi_action) summed over the action dim.
        # Note ((pi_action - mean)/std)**2 == eps**2.
        logp = -0.5 * (eps * eps) - jnp.log(std) - 0.5 * log2pi
        # tanh-squash correction: 2*(log 2 - a - softplus(-2a))
        corr = 2.0 * (ln2 - pi_action - _softplus(-2.0 * pi_action))
        logp_pi = jnp.sum(logp - corr, axis=-1, keepdims=True)

        # Packed output slab: lanes [0:A] = squashed action, lane A = logp.
        out_ref[:, :A] = act_limit * jnp.tanh(pi_action)
        out_ref[:, A:] = logp_pi

    return kernel


def pack_params(params):
    """Cast weights to bf16 and fuse the two head layers. Call once, outside the hot path."""
    bf16 = jnp.bfloat16
    return dict(
        w1=params["w1"].astype(bf16), b1=params["b1"],
        w2=params["w2"].astype(bf16), b2=params["b2"],
        w3=params["w3"].astype(bf16), b3=params["b3"],
        wh=jnp.concatenate([params["wm"], params["ws"]], axis=1).astype(bf16),
        bh=jnp.concatenate([params["bm"], params["bs"]], axis=1),
    )


def _batch_block(b):
    """Largest batch block (<=512, multiple of 8) that divides B; else one block of B rows."""
    for tb in (512, 256, 128, 64, 32, 16, 8):
        if b % tb == 0:
            return tb
    return b


def policy_net_forward(x, packed, noise, act_limit):
    """x: (B, obs) f32, noise: (B, A) f32. Returns (pi_action (B, A), logp_pi (B,))."""
    B, obs = x.shape
    two_a = packed["wh"].shape[1]
    A = two_a // 2
    TB = _batch_block(B)
    grid = (B // TB,)

    const = lambda shape: pl.BlockSpec(shape, lambda i: (0, 0))      # VMEM-resident weights
    batched = lambda shape: pl.BlockSpec(shape, lambda i: (i, 0))    # pipelined per batch tile

    kernel = _make_policy_kernel(float(act_limit), A)
    out = pl.pallas_call(
        kernel,
        out_shape=jax.ShapeDtypeStruct((B, A + 1), jnp.float32),
        grid_spec=pltpu.PrefetchScalarGridSpec(
            num_scalar_prefetch=0,
            grid=grid,
            in_specs=[
                batched((TB, obs)),
                const((obs, HIDDEN)), const((1, HIDDEN)),
                const((HIDDEN, HIDDEN)), const((1, HIDDEN)),
                const((HIDDEN, HIDDEN)), const((1, HIDDEN)),
                const((HIDDEN, two_a)), const((1, two_a)),
                batched((TB, A)),
            ],
            out_specs=batched((TB, A + 1)),
        ),
        compiler_params=pltpu.CompilerParams(
            dimension_semantics=("parallel",),          # shards batch tiles across TCs (v7x)
            vmem_limit_bytes=48 * 1024 * 1024,          # headroom under v7x 64 MiB VMEM
        ),
    )(x, packed["w1"], packed["b1"], packed["w2"], packed["b2"],
      packed["w3"], packed["b3"], packed["wh"], packed["bh"], noise)

    return out[:, :A], out[:, A]


def init_params(key, observations, actions):
    """Deterministic init mimicking PyTorch nn.Linear default (uniform +-1/sqrt(fan_in))."""
    def linear(key, fan_in, fan_out):
        kw, kb = jax.random.split(key)
        bound = 1.0 / math.sqrt(fan_in)
        w = jax.random.uniform(kw, (fan_in, fan_out), jnp.float32, -bound, bound)
        b = jax.random.uniform(kb, (1, fan_out), jnp.float32, -bound, bound)
        return w, b

    k1, k2, k3, k4, k5 = jax.random.split(key, 5)
    w1, b1 = linear(k1, observations, HIDDEN)
    w2, b2 = linear(k2, HIDDEN, HIDDEN)
    w3, b3 = linear(k3, HIDDEN, HIDDEN)
    wm, bm = linear(k4, HIDDEN, actions)
    ws, bs = linear(k5, HIDDEN, actions)
    return dict(w1=w1, b1=b1, w2=w2, b2=b2, w3=w3, b3=b3,
                wm=wm, bm=bm, ws=ws, bs=bs)


def policy_net_reference(x, params, noise, act_limit):
    """Pure-JAX reference of the PyTorch forward (noise injected for rsample).

    Uses the same bf16-operand / f32-accumulation matmul semantics as the kernel so the
    comparison isolates kernel correctness rather than bf16 weight quantization.
    """
    bf16 = jnp.bfloat16
    dot = lambda a, w: jnp.dot(a.astype(bf16), w.astype(bf16),
                               preferred_element_type=jnp.float32)
    h = jax.nn.relu(dot(x, params["w1"]) + params["b1"])
    h = jax.nn.relu(dot(h, params["w2"]) + params["b2"])
    h = jax.nn.relu(dot(h, params["w3"]) + params["b3"])
    mean = jnp.tanh(dot(h, params["wm"]) + params["bm"])
    std = 0.1 + (STD_MAX_NOISE - 0.1) * jax.nn.sigmoid(dot(h, params["ws"]) + params["bs"])
    pi_action = mean + std * noise
    logp = -0.5 * ((pi_action - mean) / std) ** 2 - jnp.log(std) - 0.5 * math.log(2 * math.pi)
    logp_pi = jnp.sum(logp, axis=-1)
    logp_pi -= jnp.sum(2.0 * (math.log(2.0) - pi_action - jax.nn.softplus(-2.0 * pi_action)), axis=1)
    pi_action = act_limit * jnp.tanh(pi_action)
    return pi_action, logp_pi


if __name__ == "__main__":
    key = jax.random.PRNGKey(0)
    k_params, k_x, k_noise = jax.random.split(key, 3)

    B, OBS, ACTIONS = 8, 24, 6
    ACT_LIMIT = 1.0

    params = init_params(k_params, OBS, ACTIONS)
    packed = pack_params(params)
    x = jax.random.normal(k_x, (B, OBS), jnp.float32)
    noise = jax.random.normal(k_noise, (B, ACTIONS), jnp.float32)  # rsample() epsilon

    pi_action, logp_pi = policy_net_forward(x, packed, noise, ACT_LIMIT)
    pi_action = jax.block_until_ready(pi_action)
    logp_pi = jax.block_until_ready(logp_pi)

    pi_ref, logp_ref = policy_net_reference(x, params, noise, ACT_LIMIT)
    assert pi_action.shape == (B, ACTIONS) and logp_pi.shape == (B,)
    # Tolerances account for bf16 MXU operands and the EUP approx reciprocal in sigmoid.
    assert jnp.allclose(pi_action, pi_ref, atol=1e-2, rtol=1e-2)
    assert jnp.allclose(logp_pi, logp_ref, atol=5e-2, rtol=2e-2)

    print("KERNEL_OK")
</pallas_src>

<mosaic_0001>
module attributes {stable_mosaic.version = 11 : i64} {
  func.func @kernel(%arg0: i32, %arg1: memref<8x24xf32, #tpu.memory_space<vmem>>, %arg2: memref<24x512xbf16, #tpu.memory_space<vmem>>, %arg3: memref<1x512xf32, #tpu.memory_space<vmem>>, %arg4: memref<512x512xbf16, #tpu.memory_space<vmem>>, %arg5: memref<1x512xf32, #tpu.memory_space<vmem>>, %arg6: memref<512x512xbf16, #tpu.memory_space<vmem>>, %arg7: memref<1x512xf32, #tpu.memory_space<vmem>>, %arg8: memref<512x12xbf16, #tpu.memory_space<vmem>>, %arg9: memref<1x12xf32, #tpu.memory_space<vmem>>, %arg10: memref<8x6xf32, #tpu.memory_space<vmem>>, %arg11: memref<8x7xf32, #tpu.memory_space<vmem>>) attributes {dimension_semantics = [#tpu.dimension_semantics<parallel>], iteration_bounds = array<i64: 1>, scalar_prefetch = 0 : i64, scratch_operands = 0 : i64, tpu.core_type = #tpu.core_type<tc>, window_params = [{transform_indices = @transform_0, window_bounds = array<i64: 8, 24>}, {pipeline_mode = #tpu.pipeline_mode<synchronous>, transform_indices = @transform_1, window_bounds = array<i64: 24, 512>}, {pipeline_mode = #tpu.pipeline_mode<synchronous>, transform_indices = @transform_2, window_bounds = array<i64: 1, 512>}, {pipeline_mode = #tpu.pipeline_mode<synchronous>, transform_indices = @transform_3, window_bounds = array<i64: 512, 512>}, {pipeline_mode = #tpu.pipeline_mode<synchronous>, transform_indices = @transform_4, window_bounds = array<i64: 1, 512>}, {pipeline_mode = #tpu.pipeline_mode<synchronous>, transform_indices = @transform_5, window_bounds = array<i64: 512, 512>}, {pipeline_mode = #tpu.pipeline_mode<synchronous>, transform_indices = @transform_6, window_bounds = array<i64: 1, 512>}, {pipeline_mode = #tpu.pipeline_mode<synchronous>, transform_indices = @transform_7, window_bounds = array<i64: 512, 12>}, {pipeline_mode = #tpu.pipeline_mode<synchronous>, transform_indices = @transform_8, window_bounds = array<i64: 1, 12>}, {transform_indices = @transform_9, window_bounds = array<i64: 8, 6>}, {transform_indices = @transform_10, window_bounds = array<i64: 8, 7>}]} {
    %c0 = arith.constant 0 : index
    %c0_0 = arith.constant 0 : index
    %0 = vector.load %arg1[%c0, %c0_0] : memref<8x24xf32, #tpu.memory_space<vmem>>, vector<8x24xf32>
    %1 = arith.truncf %0 : vector<8x24xf32> to vector<8x24xbf16>
    %c0_1 = arith.constant 0 : index
    %c0_2 = arith.constant 0 : index
    %2 = vector.load %arg2[%c0_1, %c0_2] : memref<24x512xbf16, #tpu.memory_space<vmem>>, vector<24x512xbf16>
    %cst = arith.constant dense<0.000000e+00> : vector<8x512xf32>
    %3 = tpu.matmul %1, %2, %cst {dimension_numbers = #tpu.dot_dimension_numbers<[1], [0], [0], [1], [0, 0, 1, 1], [], []>} : vector<8x24xbf16>, vector<24x512xbf16>, vector<8x512xf32> -> vector<8x512xf32>
    %c0_3 = arith.constant 0 : index
    %c0_4 = arith.constant 0 : index
    %4 = vector.load %arg3[%c0_3, %c0_4] : memref<1x512xf32, #tpu.memory_space<vmem>>, vector<1x512xf32>
    %5 = vector.broadcast %4 : vector<1x512xf32> to vector<8x512xf32>
    %6 = arith.addf %3, %5 : vector<8x512xf32>
    %cst_5 = arith.constant 0.000000e+00 : f32
    %7 = vector.broadcast %cst_5 : f32 to vector<8x512xf32>
    %8 = arith.maximumf %6, %7 : vector<8x512xf32>
    %9 = arith.truncf %8 : vector<8x512xf32> to vector<8x512xbf16>
    %c0_6 = arith.constant 0 : index
    %c0_7 = arith.constant 0 : index
    %10 = vector.load %arg4[%c0_6, %c0_7] : memref<512x512xbf16, #tpu.memory_space<vmem>>, vector<512x512xbf16>
    %cst_8 = arith.constant dense<0.000000e+00> : vector<8x512xf32>
    %11 = tpu.matmul %9, %10, %cst_8 {dimension_numbers = #tpu.dot_dimension_numbers<[1], [0], [0], [1], [0, 0, 1, 1], [], []>} : vector<8x512xbf16>, vector<512x512xbf16>, vector<8x512xf32> -> vector<8x512xf32>
    %c0_9 = arith.constant 0 : index
    %c0_10 = arith.constant 0 : index
    %12 = vector.load %arg5[%c0_9, %c0_10] : memref<1x512xf32, #tpu.memory_space<vmem>>, vector<1x512xf32>
    %13 = vector.broadcast %12 : vector<1x512xf32> to vector<8x512xf32>
    %14 = arith.addf %11, %13 : vector<8x512xf32>
    %cst_11 = arith.constant 0.000000e+00 : f32
    %15 = vector.broadcast %cst_11 : f32 to vector<8x512xf32>
    %16 = arith.maximumf %14, %15 : vector<8x512xf32>
    %17 = arith.truncf %16 : vector<8x512xf32> to vector<8x512xbf16>
    %c0_12 = arith.constant 0 : index
    %c0_13 = arith.constant 0 : index
    %18 = vector.load %arg6[%c0_12, %c0_13] : memref<512x512xbf16, #tpu.memory_space<vmem>>, vector<512x512xbf16>
    %cst_14 = arith.constant dense<0.000000e+00> : vector<8x512xf32>
    %19 = tpu.matmul %17, %18, %cst_14 {dimension_numbers = #tpu.dot_dimension_numbers<[1], [0], [0], [1], [0, 0, 1, 1], [], []>} : vector<8x512xbf16>, vector<512x512xbf16>, vector<8x512xf32> -> vector<8x512xf32>
    %c0_15 = arith.constant 0 : index
    %c0_16 = arith.constant 0 : index
    %20 = vector.load %arg7[%c0_15, %c0_16] : memref<1x512xf32, #tpu.memory_space<vmem>>, vector<1x512xf32>
    %21 = vector.broadcast %20 : vector<1x512xf32> to vector<8x512xf32>
    %22 = arith.addf %19, %21 : vector<8x512xf32>
    %cst_17 = arith.constant 0.000000e+00 : f32
    %23 = vector.broadcast %cst_17 : f32 to vector<8x512xf32>
    %24 = arith.maximumf %22, %23 : vector<8x512xf32>
    %25 = arith.truncf %24 : vector<8x512xf32> to vector<8x512xbf16>
    %c0_18 = arith.constant 0 : index
    %c0_19 = arith.constant 0 : index
    %26 = vector.load %arg8[%c0_18, %c0_19] : memref<512x12xbf16, #tpu.memory_space<vmem>>, vector<512x12xbf16>
    %cst_20 = arith.constant dense<0.000000e+00> : vector<8x12xf32>
    %27 = tpu.matmul %25, %26, %cst_20 {dimension_numbers = #tpu.dot_dimension_numbers<[1], [0], [0], [1], [0, 0, 1, 1], [], []>} : vector<8x512xbf16>, vector<512x12xbf16>, vector<8x12xf32> -> vector<8x12xf32>
    %c0_21 = arith.constant 0 : index
    %c0_22 = arith.constant 0 : index
    %28 = vector.load %arg9[%c0_21, %c0_22] : memref<1x12xf32, #tpu.memory_space<vmem>>, vector<1x12xf32>
    %29 = vector.broadcast %28 : vector<1x12xf32> to vector<8x12xf32>
    %30 = arith.addf %27, %29 : vector<8x12xf32>
    %31 = vector.extract_strided_slice %30 {offsets = [0, 0], sizes = [8, 6], strides = [1, 1]} : vector<8x12xf32> to vector<8x6xf32>
    %32 = vector.extract_strided_slice %30 {offsets = [0, 6], sizes = [8, 6], strides = [1, 1]} : vector<8x12xf32> to vector<8x6xf32>
    %33 = math.tanh %31 : vector<8x6xf32>
    %cst_23 = arith.constant 0.000000e+00 : f32
    %34 = vector.broadcast %cst_23 : f32 to vector<8x6xf32>
    %35 = arith.subf %34, %32 : vector<8x6xf32>
    %36 = math.exp %35 : vector<8x6xf32>
    %cst_24 = arith.constant 1.000000e+00 : f32
    %37 = vector.broadcast %cst_24 : f32 to vector<8x6xf32>
    %38 = arith.addf %37, %36 : vector<8x6xf32>
    %39 = tpu.reciprocal %38 {approx = true} : vector<8x6xf32> -> vector<8x6xf32>
    %cst_25 = arith.constant 0.899999976 : f32
    %40 = vector.broadcast %cst_25 : f32 to vector<8x6xf32>
    %41 = arith.mulf %40, %39 : vector<8x6xf32>
    %cst_26 = arith.constant 1.000000e-01 : f32
    %42 = vector.broadcast %cst_26 : f32 to vector<8x6xf32>
    %43 = arith.addf %42, %41 : vector<8x6xf32>
    %c0_27 = arith.constant 0 : index
    %c0_28 = arith.constant 0 : index
    %44 = vector.load %arg10[%c0_27, %c0_28] : memref<8x6xf32, #tpu.memory_space<vmem>>, vector<8x6xf32>
    %45 = arith.mulf %43, %44 : vector<8x6xf32>
    %46 = arith.addf %33, %45 : vector<8x6xf32>
    %47 = arith.mulf %44, %44 : vector<8x6xf32>
    %cst_29 = arith.constant -5.000000e-01 : f32
    %48 = vector.broadcast %cst_29 : f32 to vector<8x6xf32>
    %49 = arith.mulf %48, %47 : vector<8x6xf32>
    %50 = math.log %43 : vector<8x6xf32>
    %51 = arith.subf %49, %50 : vector<8x6xf32>
    %cst_30 = arith.constant 0.918938517 : f32
    %52 = vector.broadcast %cst_30 : f32 to vector<8x6xf32>
    %53 = arith.subf %51, %52 : vector<8x6xf32>
    %cst_31 = arith.constant 0.693147182 : f32
    %54 = vector.broadcast %cst_31 : f32 to vector<8x6xf32>
    %55 = arith.subf %54, %46 : vector<8x6xf32>
    %cst_32 = arith.constant -2.000000e+00 : f32
    %56 = vector.broadcast %cst_32 : f32 to vector<8x6xf32>
    %57 = arith.mulf %56, %46 : vector<8x6xf32>
    %cst_33 = arith.constant 0.000000e+00 : f32
    %58 = vector.broadcast %cst_33 : f32 to vector<8x6xf32>
    %59 = arith.maximumf %57, %58 : vector<8x6xf32>
    %60 = math.absf %57 : vector<8x6xf32>
    %cst_34 = arith.constant 0.000000e+00 : f32
    %61 = vector.broadcast %cst_34 : f32 to vector<8x6xf32>
    %62 = arith.subf %61, %60 : vector<8x6xf32>
    %63 = math.exp %62 : vector<8x6xf32>
    %64 = math.log1p %63 : vector<8x6xf32>
    %65 = arith.addf %59, %64 : vector<8x6xf32>
    %66 = arith.subf %55, %65 : vector<8x6xf32>
    %cst_35 = arith.constant 2.000000e+00 : f32
    %67 = vector.broadcast %cst_35 : f32 to vector<8x6xf32>
    %68 = arith.mulf %67, %66 : vector<8x6xf32>
    %69 = arith.subf %53, %68 : vector<8x6xf32>
    %cst_36 = arith.constant dense<0.000000e+00> : vector<8xf32>
    %70 = vector.multi_reduction <add>, %69, %cst_36 [1] : vector<8x6xf32> to vector<8xf32>
    %71 = vector.shape_cast %70 : vector<8xf32> to vector<8x1xf32>
    %72 = math.tanh %46 : vector<8x6xf32>
    %cst_37 = arith.constant 1.000000e+00 : f32
    %73 = vector.broadcast %cst_37 : f32 to vector<8x6xf32>
    %74 = arith.mulf %73, %72 : vector<8x6xf32>
    %c0_38 = arith.constant 0 : index
    %c0_39 = arith.constant 0 : index
    %75 = vector.load %arg11[%c0_38, %c0_39] : memref<8x7xf32, #tpu.memory_space<vmem>>, vector<8x6xf32>
    tpu.vector_store %arg11[%c0_38, %c0_39], %74 {strides = array<i32>} : memref<8x7xf32, #tpu.memory_space<vmem>>, vector<8x6xf32>,
    %c0_40 = arith.constant 0 : index
    %c6 = arith.constant 6 : index
    %76 = vector.load %arg11[%c0_40, %c6] : memref<8x7xf32, #tpu.memory_space<vmem>>, vector<8x1xf32>
    tpu.vector_store %arg11[%c0_40, %c6], %71 {strides = array<i32>} : memref<8x7xf32, #tpu.memory_space<vmem>>, vector<8x1xf32>,
    return
  }
  func.func @transform_0(%arg0: i32) -> (i32, i32) {
    %c0_i32 = arith.constant 0 : i32
    %c0_i32_0 = arith.constant 0 : i32
    return %arg0, %c0_i32 : i32, i32
  }
  func.func @transform_1(%arg0: i32) -> (i32, i32) {
    %c0_i32 = arith.constant 0 : i32
    %c0_i32_0 = arith.constant 0 : i32
    %c0_i32_1 = arith.constant 0 : i32
    return %c0_i32, %c0_i32_0 : i32, i32
  }
  func.func @transform_2(%arg0: i32) -> (i32, i32) {
    %c0_i32 = arith.constant 0 : i32
    %c0_i32_0 = arith.constant 0 : i32
    %c0_i32_1 = arith.constant 0 : i32
    return %c0_i32, %c0_i32_0 : i32, i32
  }
  func.func @transform_3(%arg0: i32) -> (i32, i32) {
    %c0_i32 = arith.constant 0 : i32
    %c0_i32_0 = arith.constant 0 : i32
    %c0_i32_1 = arith.constant 0 : i32
    return %c0_i32, %c0_i32_0 : i32, i32
  }
  func.func @transform_4(%arg0: i32) -> (i32, i32) {
    %c0_i32 = arith.constant 0 : i32
    %c0_i32_0 = arith.constant 0 : i32
    %c0_i32_1 = arith.constant 0 : i32
    return %c0_i32, %c0_i32_0 : i32, i32
  }
  func.func @transform_5(%arg0: i32) -> (i32, i32) {
    %c0_i32 = arith.constant 0 : i32
    %c0_i32_0 = arith.constant 0 : i32
    %c0_i32_1 = arith.constant 0 : i32
    return %c0_i32, %c0_i32_0 : i32, i32
  }
  func.func @transform_6(%arg0: i32) -> (i32, i32) {
    %c0_i32 = arith.constant 0 : i32
    %c0_i32_0 = arith.constant 0 : i32
    %c0_i32_1 = arith.constant 0 : i32
    return %c0_i32, %c0_i32_0 : i32, i32
  }
  func.func @transform_7(%arg0: i32) -> (i32, i32) {
    %c0_i32 = arith.constant 0 : i32
    %c0_i32_0 = arith.constant 0 : i32
    %c0_i32_1 = arith.constant 0 : i32
    return %c0_i32, %c0_i32_0 : i32, i32
  }
  func.func @transform_8(%arg0: i32) -> (i32, i32) {
    %c0_i32 = arith.constant 0 : i32
    %c0_i32_0 = arith.constant 0 : i32
    %c0_i32_1 = arith.constant 0 : i32
    return %c0_i32, %c0_i32_0 : i32, i32
  }
  func.func @transform_9(%arg0: i32) -> (i32, i32) {
    %c0_i32 = arith.constant 0 : i32
    %c0_i32_0 = arith.constant 0 : i32
    return %arg0, %c0_i32 : i32, i32
  }
  func.func @transform_10(%arg0: i32) -> (i32, i32) {
    %c0_i32 = arith.constant 0 : i32
    %c0_i32_0 = arith.constant 0 : i32
    return %arg0, %c0_i32 : i32, i32
  }
}

</mosaic_0001>

<bundles_post_ra>
// kernel: tpu_custom_call.1
= control target key start
LH: loop header
LB: loop body
LE: loop exit
PB: predicated region body
PF: predicated region fallthrough
CT: control target
= control target key end

     0   :  { %15 = vsyncpa [#allocation3], 0  ;;  %s3748_s0 = inlined_call_operand.vmem [shape: f32[8,24], index: 0, kind: input, shape index: {}]   ;;  %s3749_s1 = inlined_call_operand.vmem [shape: bf16[24,512], index: 1, kind: input, shape index: {}]   ;;  %s3750_s2 = inlined_call_operand.vmem [shape: f32[1,512], index: 2, kind: input, shape index: {}]   ;;  %s3751_s3 = inlined_call_operand.hbm [shape: bf16[512,512], index: 3, kind: input, shape index: {}]   ;;  %s3752_s4 = inlined_call_operand.vmem [shape: f32[1,512], index: 4, kind: input, shape index: {}]   ;;  %s3753_s5 = inlined_call_operand.hbm [shape: bf16[512,512], index: 5, kind: input, shape index: {}]   ;;  %s3754_s6 = inlined_call_operand.vmem [shape: f32[1,512], index: 6, kind: input, shape index: {}]   ;;  %s3755_s7 = inlined_call_operand.vmem [shape: bf16[512,12], index: 7, kind: input, shape index: {}]   ;;  %s3756_s8 = inlined_call_operand.vmem [shape: f32[1,12], index: 8, kind: input, shape index: {}]   ;;  %s3757_s9 = inlined_call_operand.vmem [shape: f32[8,6], index: 9, kind: input, shape index: {}]   ;;  %s3758_s10 = inlined_call_operand.hbm [shape: f32[8,7], index: 10, kind: output, shape index: {}]  }
   0x1   :  { %16 = vsyncpa [#allocation6], 0 }
   0x2   :  { %17 = vsyncpa [#allocation4], 0  ;;  %s3462_s13 = smov [#allocation2]   ;;  %s3390_s17 = scalar_lea.hbm %s3751_s3, 16384 }
   0x3   :  { %s29_s14 = sshll.u32 %s3462_s13, 4  ;;  %p3391_p0 = scmp.ne.s32.totalorder %s3751_s3, %s3390_s17  ;;  %s30_s14 = int_to_ptr.vmem [resolvable:$true] %s29_s14 }
   0x4   :  { %p3394_p1 = scmp.lt.u32.totalorder %s3390_s17, %s3751_s3 }
   0x6   :  { %p3396_p2 = pnand %p3394_p1, %p3391_p0 }
   0x8   :  { %3399 = shalt.err (!%p3396_p2)
}
   0x9   :  { %s3400_s22 = scalar_lea.vmem %s30_s14, 16384  ;;  %p3405_p4 = scmp.lt.s32.totalorder %s30_s14, %s30_s14 }
   0xa   :  { %p3401_p3 = scmp.ne.s32.totalorder %s30_s14, %s3400_s22  ;;  %p3406_p5 = scmp.lt.s32.totalorder %s3400_s22, %s3400_s22 }
   0xc   :  { %p3407_p6 = por %p3406_p5, %p3405_p4 }
   0xe   :  { %p3408_p7 = pnand %p3407_p6, %p3401_p3 }
  0x10   :  { %3411 = shalt.err (!%p3408_p7)
}
  0x11   :  { %s3463_s23 = smov 256   ;;  %s3464_s24 = smov 16  }
  0x12   :  { %35 = dma.hbm_to_vmem [thread:$0]  %s3751_s3, 16384, %s30_s14, [#allocation3], %s3463_s23, %s3463_s23, %s3464_s24  }
  0x13   :  { %s3465_s27 = smov [#allocation5]   ;;  %s3412_s11 = scalar_lea.hbm %s3753_s5, 16384 }
  0x14   :  { %s43_s28 = sshll.u32 %s3465_s27, 4  ;;  %p3413_p8 = scmp.ne.s32.totalorder %s3753_s5, %s3412_s11  ;;  %s44_s28 = int_to_ptr.vmem [resolvable:$true] %s43_s28 }
  0x15   :  { %p3416_p9 = scmp.lt.u32.totalorder %s3412_s11, %s3753_s5 }
  0x17   :  { %p3418_p10 = pnand %p3416_p9, %p3413_p8 }
  0x19   :  { %3421 = shalt.err (!%p3418_p10)
}
  0x1a   :  { %s3422_s17 = scalar_lea.vmem %s44_s28, 16384  ;;  %p3427_p12 = scmp.lt.s32.totalorder %s44_s28, %s44_s28 }
  0x1b   :  { %p3423_p11 = scmp.ne.s32.totalorder %s44_s28, %s3422_s17  ;;  %p3428_p13 = scmp.lt.s32.totalorder %s3422_s17, %s3422_s17 }
  0x1d   :  { %p3429_p0 = por %p3428_p13, %p3427_p12 }
  0x1f   :  { %p3430_p1 = pnand %p3429_p0, %p3423_p11 }
  0x21   :  { %3433 = shalt.err (!%p3430_p1)
}
  0x22   :  { %49 = dma.hbm_to_vmem [thread:$0]  %s3753_s5, 16384, %s44_s28, [#allocation6], %s3463_s23, %s3463_s23, %s3464_s24  }
  0x23   :  { %3456 = dma.done.wait [#allocation3], 16384  }
  0x24   :  { %3457 = vsyncadd [#allocation3], 4294950912 }
  0x25   :  { %3458 = dma.done.wait [#allocation6], 16384  }
  0x26   :  { %3459 = vsyncadd [#allocation6], 4294950912  ;;  %v3466_v0 = vmov 0   ;;  %v2950_v1 = vld [vmem:[%s3749_s1 + $0x4] ss:$16 sps:$4 sm:$0xff]   ;;  %vm129_vm0 = vcmask 1043456  }
  0x27   :  { %174 = vmatprep.mubr.bf16.mxu0 %v3466_v0  ;;  %215 = vmatprep.mubr.bf16.mxu1 %v3466_v0  ;;  %v2952_v2 = vld [vmem:[%s3749_s1] ss:$16 sps:$4 sm:$0xff]   ;;  %v2955_v7 = vld [vmem:[%s3749_s1 + $0xc] ss:$16 sps:$4 sm:$0xff]   ;;  %v2957_v8 = vld [vmem:[%s3749_s1 + $0x8] ss:$16 sps:$4 sm:$0xff]  }
  0x28   :  { %v71_v3 = vld [vmem:[%s3749_s1 + $0x20] sm:$0xff]  ;;  %142 = vmatprep.subr.bf16.mxu0 %v2950_v1  ;;  %v72_v9 = vld [vmem:[%s3749_s1 + $0x28] sm:$0xff]  ;;  %183 = vmatprep.subr.bf16.mxu1 %v2955_v7  ;;  %vm125_vm1 = vcmask 195584   ;;  %s3467_s5 = smov 6   ;;  %vm2548_vm2 = vcmask 48128   ;;  %vm2554_vm4 = vcmask 56368  }
  0x29   :  { %v65_v4 = vld [vmem:[%s3748_s0] sm:$0xff]  ;;  %v2577_v5 = vcombine.high %v71_v3, %v71_v3  ;;  %v2576_v6 = vcombine.low %v71_v3, %v71_v3  ;;  %143 = vmatpush1.bf16.msra.mxu0 %v2952_v2  ;;  %v2579_v11 = vcombine.high %v72_v9, %v72_v9  ;;  %v2578_v12 = vcombine.low %v72_v9, %v72_v9  ;;  %v2965_v16 = vld [vmem:[#allocation2 + $0xc] ss:$16 sps:$4 sm:$0xff]   ;;  %v2963_v19 = vld [vmem:[#allocation2 + $0x8] ss:$16 sps:$4 sm:$0xff]  }
  0x2a   :  { %v2962_v13 = vld [vmem:[#allocation2 + $0x4] ss:$16 sps:$4 sm:$0xff]   ;;  %184 = vmatpush1.bf16.msra.mxu1 %v2957_v8  ;;  %v66_v14 = vpack.c.bf16 %v65_v4, %v65_v4  ;;  %v2960_v17 = vld [vmem:[#allocation2] ss:$16 sps:$4 sm:$0xff]   ;;  %v2971_v20 = vld [vmem:[#allocation2 + $0x2c] ss:$16 sps:$4 sm:$0xff]  }
  0x2b   :  { %2580 = vmatprep.subr.msk.bf16.mxu0 %vm129_vm0, %v2577_v5  ;;  %v131_v10 = vsel %vm129_vm0, %v2576_v6, 0  ;;  %2582 = vmatprep.subr.msk.bf16.mxu1 %vm129_vm0, %v2579_v11  ;;  %v137_v15 = vsel %vm129_vm0, %v2578_v12, 0  ;;  %v2968_v18 = vld [vmem:[#allocation2 + $0x24] ss:$16 sps:$4 sm:$0xff]   ;;  %v2966_v21 = vld [vmem:[#allocation2 + $0x20] ss:$16 sps:$4 sm:$0xff]  }
  0x2c   :  { %v2974_v22 = vld [vmem:[#allocation2 + $0x44] ss:$16 sps:$4 sm:$0xff]   ;;  %v2969_v23 = vld [vmem:[#allocation2 + $0x28] ss:$16 sps:$4 sm:$0xff]   ;;  %v2977_v24 = vld [vmem:[#allocation2 + $0x4c] ss:$16 sps:$4 sm:$0xff]  }
  0x2d   :  { %145 = vmatpush1.bf16.msra.mxu0 %v131_v10  ;;  %v2972_v25 = vld [vmem:[#allocation2 + $0x40] ss:$16 sps:$4 sm:$0xff]   ;;  %v2980_v26 = vld [vmem:[#allocation2 + $0x64] ss:$16 sps:$4 sm:$0xff]   ;;  %v2975_v27 = vld [vmem:[#allocation2 + $0x48] ss:$16 sps:$4 sm:$0xff]  }
  0x2e   :  { %1022 = vmatprep.subr.bf16.mxu0 %v2962_v13  ;;  %186 = vmatpush1.bf16.msra.mxu1 %v137_v15  ;;  %v2983_v28 = vld [vmem:[#allocation2 + $0x6c] ss:$16 sps:$4 sm:$0xff]   ;;  %v2978_v29 = vld [vmem:[#allocation2 + $0x60] ss:$16 sps:$4 sm:$0xff]   ;;  %v2986_v30 = vld [vmem:[#allocation2 + $0x84] ss:$16 sps:$4 sm:$0xff]  }
  0x2f   :  { %1104 = vmatprep.subr.bf16.mxu1 %v2965_v16  ;;  %v2981_v31 = vld [vmem:[#allocation2 + $0x68] ss:$16 sps:$4 sm:$0xff]   ;;  %v2989_v32 = vld [vmem:[#allocation2 + $0x8c] ss:$16 sps:$4 sm:$0xff]   ;;  %v2984_v33 = vld [vmem:[#allocation2 + $0x80] ss:$16 sps:$4 sm:$0xff]  }
  0x30   :  { %2581 = vmatmul.mubr.msk.bf16.vlgmr.msra.gmra.mrb[0].mxu0 %vm125_vm1, %v66_v14  ;;  %v2992_v34 = vld [vmem:[#allocation2 + $0xa4] ss:$16 sps:$4 sm:$0xff]   ;;  %v2987_v35 = vld [vmem:[#allocation2 + $0x88] ss:$16 sps:$4 sm:$0xff]   ;;  %v2995_v36 = vld [vmem:[#allocation2 + $0xac] ss:$16 sps:$4 sm:$0xff]  }
  0x31   :  { %1023 = vmatpush1.bf16.msra.mxu0 %v2960_v17  ;;  %2583 = vmatmul.mubr.msk.bf16.vlgmr.msra.gmra.mrb[0].mxu1 %vm125_vm1, %v66_v14  ;;  %v2990_v37 = vld [vmem:[#allocation2 + $0xa0] ss:$16 sps:$4 sm:$0xff]   ;;  %v2998_v38 = vld [vmem:[#allocation2 + $0xc4] ss:$16 sps:$4 sm:$0xff]   ;;  %v2993_v39 = vld [vmem:[#allocation2 + $0xa8] ss:$16 sps:$4 sm:$0xff]   ;;  %v75_v17 = vlaneseq }
  0x32   :  { %1024 = vmatprep.subr.bf16.mxu0 %v2968_v18  ;;  %1105 = vmatpush1.bf16.msra.mxu1 %v2963_v19  ;;  %v3001_v40 = vld [vmem:[#allocation2 + $0xcc] ss:$16 sps:$4 sm:$0xff]   ;;  %v2996_v41 = vld [vmem:[#allocation2 + $0xc0] ss:$16 sps:$4 sm:$0xff]   ;;  %v3004_v42 = vld [vmem:[#allocation2 + $0xe4] ss:$16 sps:$4 sm:$0xff]  }
  0x33   :  { %1106 = vmatprep.subr.bf16.mxu1 %v2971_v20  ;;  %v2999_v43 = vld [vmem:[#allocation2 + $0xc8] ss:$16 sps:$4 sm:$0xff]   ;;  %v3007_v44 = vld [vmem:[#allocation2 + $0xec] ss:$16 sps:$4 sm:$0xff]   ;;  %v3002_v45 = vld [vmem:[#allocation2 + $0xe0] ss:$16 sps:$4 sm:$0xff]  }
  0x34   :  { %v3010_v46 = vld [vmem:[#allocation2 + $0x104] ss:$16 sps:$4 sm:$0xff]   ;;  %v3005_v47 = vld [vmem:[#allocation2 + $0xe8] ss:$16 sps:$4 sm:$0xff]   ;;  %v3013_v48 = vld [vmem:[#allocation2 + $0x10c] ss:$16 sps:$4 sm:$0xff]  }
  0x35   :  { %1025 = vmatpush1.bf16.msra.mxu0 %v2966_v21  ;;  %v3008_v49 = vld [vmem:[#allocation2 + $0x100] ss:$16 sps:$4 sm:$0xff]   ;;  %v3011_v50 = vld [vmem:[#allocation2 + $0x108] ss:$16 sps:$4 sm:$0xff]   ;;  %v3016_v51 = vld [vmem:[#allocation2 + $0x124] ss:$16 sps:$4 sm:$0xff]  }
  0x36   :  { %1026 = vmatprep.subr.bf16.mxu0 %v2974_v22  ;;  %1107 = vmatpush1.bf16.msra.mxu1 %v2969_v23  ;;  %v3014_v52 = vld [vmem:[#allocation2 + $0x120] ss:$16 sps:$4 sm:$0xff]   ;;  %v3019_v53 = vld [vmem:[#allocation2 + $0x12c] ss:$16 sps:$4 sm:$0xff]   ;;  %v3022_v54 = vld [vmem:[#allocation2 + $0x144] ss:$16 sps:$4 sm:$0xff]  }
  0x37   :  { %1108 = vmatprep.subr.bf16.mxu1 %v2977_v24  ;;  %v3017_v55 = vld [vmem:[#allocation2 + $0x128] ss:$16 sps:$4 sm:$0xff]   ;;  %v3025_v56 = vld [vmem:[#allocation2 + $0x14c] ss:$16 sps:$4 sm:$0xff]   ;;  %v3020_v57 = vld [vmem:[#allocation2 + $0x140] ss:$16 sps:$4 sm:$0xff]  }
  0x38   :  { %v3028_v58 = vld [vmem:[#allocation2 + $0x164] ss:$16 sps:$4 sm:$0xff]   ;;  %v3023_v59 = vld [vmem:[#allocation2 + $0x148] ss:$16 sps:$4 sm:$0xff]   ;;  %v3031_v60 = vld [vmem:[#allocation2 + $0x16c] ss:$16 sps:$4 sm:$0xff]  }
  0x39   :  { %1027 = vmatpush1.bf16.msra.mxu0 %v2972_v25  ;;  %v3026_v61 = vld [vmem:[#allocation2 + $0x160] ss:$16 sps:$4 sm:$0xff]   ;;  %v3034_v62 = vld [vmem:[#allocation2 + $0x184] ss:$16 sps:$4 sm:$0xff]   ;;  %v3029_v63 = vld [vmem:[#allocation2 + $0x168] ss:$16 sps:$4 sm:$0xff]  }
  0x3a   :  { %1028 = vmatprep.subr.bf16.mxu0 %v2980_v26  ;;  %1109 = vmatpush1.bf16.msra.mxu1 %v2975_v27  ;;  %v3037_v0 = vld [vmem:[#allocation2 + $0x18c] ss:$16 sps:$4 sm:$0xff]   ;;  %v3032_v1 = vld [vmem:[#allocation2 + $0x180] ss:$16 sps:$4 sm:$0xff]   ;;  %v3040_v2 = vld [vmem:[#allocation2 + $0x1a4] ss:$16 sps:$4 sm:$0xff]  }
  0x3b   :  { %1110 = vmatprep.subr.bf16.mxu1 %v2983_v28  ;;  %v3035_v3 = vld [vmem:[#allocation2 + $0x188] ss:$16 sps:$4 sm:$0xff]   ;;  %v3043_v4 = vld [vmem:[#allocation2 + $0x1ac] ss:$16 sps:$4 sm:$0xff]   ;;  %v3038_v5 = vld [vmem:[#allocation2 + $0x1a0] ss:$16 sps:$4 sm:$0xff]  }
  0x3c   :  { %v3041_v6 = vld [vmem:[#allocation2 + $0x1a8] ss:$16 sps:$4 sm:$0xff]   ;;  %v3046_v7 = vld [vmem:[#allocation2 + $0x1c4] ss:$16 sps:$4 sm:$0xff]   ;;  %v3049_v8 = vld [vmem:[#allocation2 + $0x1cc] ss:$16 sps:$4 sm:$0xff]  }
  0x3d   :  { %1029 = vmatpush1.bf16.msra.mxu0 %v2978_v29  ;;  %v3044_v9 = vld [vmem:[#allocation2 + $0x1c0] ss:$16 sps:$4 sm:$0xff]   ;;  %v3047_v10 = vld [vmem:[#allocation2 + $0x1c8] ss:$16 sps:$4 sm:$0xff]   ;;  %v3052_v11 = vld [vmem:[#allocation2 + $0x1e4] ss:$16 sps:$4 sm:$0xff]  }
  0x3e   :  { %1030 = vmatprep.subr.bf16.mxu0 %v2986_v30  ;;  %1111 = vmatpush1.bf16.msra.mxu1 %v2981_v31  ;;  %v3055_v12 = vld [vmem:[#allocation2 + $0x1ec] ss:$16 sps:$4 sm:$0xff]   ;;  %v3050_v13 = vld [vmem:[#allocation2 + $0x1e0] ss:$16 sps:$4 sm:$0xff]   ;;  %v3053_v14 = vld [vmem:[#allocation2 + $0x1e8] ss:$16 sps:$4 sm:$0xff]  }
  0x3f   :  { %1112 = vmatprep.subr.bf16.mxu1 %v2989_v32  ;;  %v3058_v15 = vld [vmem:[#allocation2 + $0x204] ss:$16 sps:$4 sm:$0xff]   ;;  %v3061_v16 = vld [vmem:[#allocation2 + $0x20c] ss:$16 sps:$4 sm:$0xff]   ;;  %v3574_v18 = vshrl.u32 %v75_v17, 7 }
  0x40   :  { %v3582_v20 = vld [vmem:[%s3750_s2] sm:$0xf]  ;;  %v3118_v17 = vld [vmem:[#allocation2 + $0x344] ss:$16 sps:$4 sm:$0xff]  }
  0x41   :  { %1031 = vmatpush1.bf16.msra.mxu0 %v2984_v33  ;;  %v3577_v19 = vsub.s32 0, %v3574_v18  ;;  %v3585_v21 = vsub.s32 1, %v3574_v18  ;;  %v3588_v22 = vsub.s32 3, %v3574_v18 }
  0x42   :  { %1032 = vmatprep.subr.bf16.mxu0 %v2992_v34  ;;  %1113 = vmatpush1.bf16.msra.mxu1 %v2987_v35 }
  0x43   :  { %1114 = vmatprep.subr.bf16.mxu1 %v2995_v36  ;;  %v78_v23 = vrot.slane %v3582_v20, %v3577_v19  ;;  %v82_v24 = vrot.slane %v3582_v20, %v3585_v21  ;;  %v90_v26 = vrot.slane %v3582_v20, %v3588_v22 }
  0x45   :  { %1033 = vmatpush1.bf16.msra.mxu0 %v2990_v37 }
  0x46   :  { %1034 = vmatprep.subr.bf16.mxu0 %v2998_v38  ;;  %1115 = vmatpush1.bf16.msra.mxu1 %v2993_v39 }
  0x47   :  { %1116 = vmatprep.subr.bf16.mxu1 %v3001_v40  ;;  %v3056_v40 = vld [vmem:[#allocation2 + $0x200] ss:$16 sps:$4 sm:$0xff]  }
  0x49   :  { %1035 = vmatpush1.bf16.msra.mxu0 %v2996_v41  ;;  %v3059_v41 = vld [vmem:[#allocation2 + $0x208] ss:$16 sps:$4 sm:$0xff]  }
  0x4a   :  { %1036 = vmatprep.subr.bf16.mxu0 %v3004_v42  ;;  %1117 = vmatpush1.bf16.msra.mxu1 %v2999_v43 }
  0x4b   :  { %1118 = vmatprep.subr.bf16.mxu1 %v3007_v44  ;;  %v3064_v44 = vld [vmem:[#allocation2 + $0x224] ss:$16 sps:$4 sm:$0xff]  }
  0x4d   :  { %1037 = vmatpush1.bf16.msra.mxu0 %v3002_v45  ;;  %v3067_v45 = vld [vmem:[#allocation2 + $0x22c] ss:$16 sps:$4 sm:$0xff]  }
  0x4e   :  { %1038 = vmatprep.subr.bf16.mxu0 %v3010_v46  ;;  %1119 = vmatpush1.bf16.msra.mxu1 %v3005_v47  ;;  %v3062_v47 = vld [vmem:[#allocation2 + $0x220] ss:$16 sps:$4 sm:$0xff]  }
  0x4f   :  { %1120 = vmatprep.subr.bf16.mxu1 %v3013_v48  ;;  %v3065_v48 = vld [vmem:[#allocation2 + $0x228] ss:$16 sps:$4 sm:$0xff]  }
  0x51   :  { %1039 = vmatpush1.bf16.msra.mxu0 %v3008_v49  ;;  %v3070_v49 = vld [vmem:[#allocation2 + $0x244] ss:$16 sps:$4 sm:$0xff]  }
  0x52   :  { %1040 = vmatprep.subr.bf16.mxu0 %v3016_v51  ;;  %1121 = vmatpush1.bf16.msra.mxu1 %v3011_v50  ;;  %v3073_v50 = vld [vmem:[#allocation2 + $0x24c] ss:$16 sps:$4 sm:$0xff]   ;;  %v3068_v51 = vld [vmem:[#allocation2 + $0x240] ss:$16 sps:$4 sm:$0xff]  }
  0x53   :  { %1122 = vmatprep.subr.bf16.mxu1 %v3019_v53  ;;  %v3076_v53 = vld [vmem:[#allocation2 + $0x264] ss:$16 sps:$4 sm:$0xff]  }
  0x55   :  { %1041 = vmatpush1.bf16.msra.mxu0 %v3014_v52  ;;  %v3071_v52 = vld [vmem:[#allocation2 + $0x248] ss:$16 sps:$4 sm:$0xff]  }
  0x56   :  { %1042 = vmatprep.subr.bf16.mxu0 %v3022_v54  ;;  %1123 = vmatpush1.bf16.msra.mxu1 %v3017_v55  ;;  %v3079_v54 = vld [vmem:[#allocation2 + $0x26c] ss:$16 sps:$4 sm:$0xff]   ;;  %v3074_v55 = vld [vmem:[#allocation2 + $0x260] ss:$16 sps:$4 sm:$0xff]  }
  0x57   :  { %1124 = vmatprep.subr.bf16.mxu1 %v3025_v56  ;;  %v3077_v56 = vld [vmem:[#allocation2 + $0x268] ss:$16 sps:$4 sm:$0xff]  }
  0x59   :  { %1043 = vmatpush1.bf16.msra.mxu0 %v3020_v57  ;;  %v3082_v57 = vld [vmem:[#allocation2 + $0x284] ss:$16 sps:$4 sm:$0xff]  }
  0x5a   :  { %1044 = vmatprep.subr.bf16.mxu0 %v3028_v58  ;;  %1125 = vmatpush1.bf16.msra.mxu1 %v3023_v59  ;;  %v3085_v58 = vld [vmem:[#allocation2 + $0x28c] ss:$16 sps:$4 sm:$0xff]   ;;  %v3080_v59 = vld [vmem:[#allocation2 + $0x280] ss:$16 sps:$4 sm:$0xff]  }
  0x5b   :  { %1126 = vmatprep.subr.bf16.mxu1 %v3031_v60  ;;  %v3083_v60 = vld [vmem:[#allocation2 + $0x288] ss:$16 sps:$4 sm:$0xff]  }
  0x5d   :  { %1045 = vmatpush1.bf16.msra.mxu0 %v3026_v61  ;;  %v3088_v61 = vld [vmem:[#allocation2 + $0x2a4] ss:$16 sps:$4 sm:$0xff]  }
  0x5e   :  { %1046 = vmatprep.subr.bf16.mxu0 %v3034_v62  ;;  %1127 = vmatpush1.bf16.msra.mxu1 %v3029_v63  ;;  %v3091_v62 = vld [vmem:[#allocation2 + $0x2ac] ss:$16 sps:$4 sm:$0xff]   ;;  %v3086_v63 = vld [vmem:[#allocation2 + $0x2a0] ss:$16 sps:$4 sm:$0xff]  }
  0x5f   :  { %1128 = vmatprep.subr.bf16.mxu1 %v3037_v0  ;;  %v3089_v0 = vld [vmem:[#allocation2 + $0x2a8] ss:$16 sps:$4 sm:$0xff]  }
  0x61   :  { %1047 = vmatpush1.bf16.msra.mxu0 %v3032_v1  ;;  %v3094_v1 = vld [vmem:[#allocation2 + $0x2c4] ss:$16 sps:$4 sm:$0xff]  }
  0x62   :  { %1048 = vmatprep.subr.bf16.mxu0 %v3040_v2  ;;  %1129 = vmatpush1.bf16.msra.mxu1 %v3035_v3  ;;  %v3097_v2 = vld [vmem:[#allocation2 + $0x2cc] ss:$16 sps:$4 sm:$0xff]   ;;  %v3092_v3 = vld [vmem:[#allocation2 + $0x2c0] ss:$16 sps:$4 sm:$0xff]  }
  0x63   :  { %1130 = vmatprep.subr.bf16.mxu1 %v3043_v4  ;;  %v3095_v4 = vld [vmem:[#allocation2 + $0x2c8] ss:$16 sps:$4 sm:$0xff]  }
  0x65   :  { %1049 = vmatpush1.bf16.msra.mxu0 %v3038_v5  ;;  %v3100_v5 = vld [vmem:[#allocation2 + $0x2e4] ss:$16 sps:$4 sm:$0xff]  }
  0x66   :  { %1131 = vmatpush1.bf16.msra.mxu1 %v3041_v6  ;;  %1050 = vmatprep.subr.bf16.mxu0 %v3046_v7  ;;  %v3103_v6 = vld [vmem:[#allocation2 + $0x2ec] ss:$16 sps:$4 sm:$0xff]   ;;  %v3098_v7 = vld [vmem:[#allocation2 + $0x2e0] ss:$16 sps:$4 sm:$0xff]  }
  0x67   :  { %1132 = vmatprep.subr.bf16.mxu1 %v3049_v8  ;;  %v3101_v8 = vld [vmem:[#allocation2 + $0x2e8] ss:$16 sps:$4 sm:$0xff]  }
  0x69   :  { %1051 = vmatpush1.bf16.msra.mxu0 %v3044_v9  ;;  %v3106_v9 = vld [vmem:[#allocation2 + $0x304] ss:$16 sps:$4 sm:$0xff]  }
  0x6a   :  { %1133 = vmatpush1.bf16.msra.mxu1 %v3047_v10  ;;  %1052 = vmatprep.subr.bf16.mxu0 %v3052_v11  ;;  %v3109_v10 = vld [vmem:[#allocation2 + $0x30c] ss:$16 sps:$4 sm:$0xff]   ;;  %v3104_v11 = vld [vmem:[#allocation2 + $0x300] ss:$16 sps:$4 sm:$0xff]  }
  0x6b   :  { %1134 = vmatprep.subr.bf16.mxu1 %v3055_v12  ;;  %v3107_v12 = vld [vmem:[#allocation2 + $0x308] ss:$16 sps:$4 sm:$0xff]  }
  0x6d   :  { %1053 = vmatpush1.bf16.msra.mxu0 %v3050_v13  ;;  %v3112_v13 = vld [vmem:[#allocation2 + $0x324] ss:$16 sps:$4 sm:$0xff]  }
  0x6e   :  { %1135 = vmatpush1.bf16.msra.mxu1 %v3053_v14  ;;  %1063 = vmatprep.subr.bf16.mxu0 %v3058_v15  ;;  %v3115_v14 = vld [vmem:[#allocation2 + $0x32c] ss:$16 sps:$4 sm:$0xff]   ;;  %v3110_v15 = vld [vmem:[#allocation2 + $0x320] ss:$16 sps:$4 sm:$0xff]  }
  0x6f   :  { %1145 = vmatprep.subr.bf16.mxu1 %v3061_v16  ;;  %v3113_v16 = vld [vmem:[#allocation2 + $0x328] ss:$16 sps:$4 sm:$0xff]  }
 0x103   :  { %v176_v25 = vpop.f32.mrb[0].mxu0 }
 0x104   :  { %v177_v27 = vadd.f32 %v176_v25, %v78_v23  ;;  %v178_v28 = vpop.f32.mrb[1].mxu0  ;;  %v3596_v31 = vpop.f32.mrb[0].mxu1  ;;  %v3121_v23 = vld [vmem:[#allocation2 + $0x34c] ss:$16 sps:$4 sm:$0xff]   ;;  %v3119_v25 = vld [vmem:[#allocation2 + $0x348] ss:$16 sps:$4 sm:$0xff]  }
 0x105   :  { %v179_v29 = vadd.f32 %v178_v28, %v82_v24  ;;  %v180_v30 = vpop.f32.mrb[2].mxu0  ;;  %v219_v34 = vpop.f32.mrb[1].mxu1  ;;  %v3116_v24 = vld [vmem:[#allocation2 + $0x340] ss:$16 sps:$4 sm:$0xff]  }
 0x106   :  { %v224_v32 = vmax.f32 %v177_v27, 0.0  ;;  %v181_v33 = vpop.f32.mrb[3].mxu0  ;;  %v220_v36 = vadd.f32 %v219_v34, %v90_v26  ;;  %v221_v37 = vpop.f32.mrb[2].mxu1  ;;  %v3124_v26 = vld [vmem:[#allocation2 + $0x364] ss:$16 sps:$4 sm:$0xff]  }
 0x107   :  { %v225_v35 = vmax.f32 %v179_v29, 0.0  ;;  %v222_v38 = vpop.f32.mrb[3].mxu1  ;;  %v3127_v27 = vld [vmem:[#allocation2 + $0x36c] ss:$16 sps:$4 sm:$0xff]   ;;  %v3122_v28 = vld [vmem:[#allocation2 + $0x360] ss:$16 sps:$4 sm:$0xff]  }
 0x108   :  { %v227_v42 = vmax.f32 %v220_v36, 0.0  ;;  %v228_v43 = vpack.c.bf16 %v224_v32, %v224_v32  ;;  %v3125_v29 = vld [vmem:[#allocation2 + $0x368] ss:$16 sps:$4 sm:$0xff]   ;;  %v3130_v30 = vld [vmem:[#allocation2 + $0x384] ss:$16 sps:$4 sm:$0xff]  }
 0x109   :  { %v229_v39 = vpack.c.bf16 %v225_v35, %v225_v35  ;;  %v3133_v32 = vld [vmem:[#allocation2 + $0x38c] ss:$16 sps:$4 sm:$0xff]   ;;  %v3128_v33 = vld [vmem:[#allocation2 + $0x380] ss:$16 sps:$4 sm:$0xff]   ;;  %v3131_v34 = vld [vmem:[#allocation2 + $0x388] ss:$16 sps:$4 sm:$0xff]  }
 0x10a   :  { %v231_v46 = vpack.c.bf16 %v227_v42, %v227_v42  ;;  %v3599_v35 = vsub.s32 2, %v3574_v18  ;;  %v3136_v36 = vld [vmem:[#allocation2 + $0x3a4] ss:$16 sps:$4 sm:$0xff]   ;;  %v3139_v37 = vld [vmem:[#allocation2 + $0x3ac] ss:$16 sps:$4 sm:$0xff]  }
 0x10b   :  { %1054 = vmatprep.mubr.bf16.mxu0 %v229_v39  ;;  %1136 = vmatprep.mubr.bf16.mxu1 %v229_v39  ;;  %v3134_v38 = vld [vmem:[#allocation2 + $0x3a0] ss:$16 sps:$4 sm:$0xff]   ;;  %v3137_v39 = vld [vmem:[#allocation2 + $0x3a8] ss:$16 sps:$4 sm:$0xff]   ;;  %v3145_v42 = vld [vmem:[#allocation2 + $0x3cc] ss:$16 sps:$4 sm:$0xff]  }
 0x10c   :  { %1055 = vmatmul.mubr.bf16.vlgmr.msra.gmra.mrb[4].mxu0 %v228_v43  ;;  %1137 = vmatmul.mubr.bf16.vlgmr.msra.gmra.mrb[4].mxu1 %v228_v43  ;;  %v3140_v43 = vld [vmem:[#allocation2 + $0x3c0] ss:$16 sps:$4 sm:$0xff]  }
 0x10d   :  { %1064 = vmatpush1.bf16.msra.mxu0 %v3056_v40  ;;  %1146 = vmatpush1.bf16.msra.mxu1 %v3059_v41  ;;  %v86_v40 = vrot.slane %v3582_v20, %v3599_v35  ;;  %v3142_v41 = vld [vmem:[#allocation2 + $0x3c4] ss:$16 sps:$4 sm:$0xff]  }
 0x10e   :  { %1065 = vmatprep.subr.bf16.mxu0 %v3064_v44  ;;  %1147 = vmatprep.subr.bf16.mxu1 %v3067_v45  ;;  %v3143_v44 = vld [vmem:[#allocation2 + $0x3c8] ss:$16 sps:$4 sm:$0xff]   ;;  %v3148_v45 = vld [vmem:[#allocation2 + $0x3e4] ss:$16 sps:$4 sm:$0xff]  }
 0x10f   :  { %1095 = vmatprep.mubr.bf16.mxu0 %v231_v46  ;;  %1177 = vmatprep.mubr.bf16.mxu1 %v231_v46  ;;  %v218_v18 = vadd.f32 %v3596_v31, %v86_v40  ;;  %v3151_v46 = vld [vmem:[#allocation2 + $0x3ec] ss:$16 sps:$4 sm:$0xff]   ;;  %v3154_v20 = vld [vmem:[#allocation5 + $0x4] ss:$16 sps:$4 sm:$0xff]  }
 0x110   :  { %v3160_v31 = vld [vmem:[#allocation5 + $0x24] ss:$16 sps:$4 sm:$0xff]  }
 0x111   :  { %1066 = vmatpush1.bf16.msra.mxu0 %v3062_v47  ;;  %1148 = vmatpush1.bf16.msra.mxu1 %v3065_v48  ;;  %v3146_v47 = vld [vmem:[#allocation2 + $0x3e0] ss:$16 sps:$4 sm:$0xff]   ;;  %v3149_v48 = vld [vmem:[#allocation2 + $0x3e8] ss:$16 sps:$4 sm:$0xff]   ;;  %v3226_v40 = vld [vmem:[#allocation5 + $0x184] ss:$16 sps:$4 sm:$0xff]  }
 0x112   :  { %1067 = vmatprep.subr.bf16.mxu0 %v3070_v49  ;;  %1149 = vmatprep.subr.bf16.mxu1 %v3073_v50  ;;  %v226_v49 = vmax.f32 %v218_v18, 0.0  ;;  %v3157_v50 = vld [vmem:[#allocation5 + $0xc] ss:$16 sps:$4 sm:$0xff]  }
 0x113   :  { %v3235_v18 = vld [vmem:[#allocation5 + $0x1ac] ss:$16 sps:$4 sm:$0xff]  }
 0x115   :  { %1068 = vmatpush1.bf16.msra.mxu0 %v3068_v51  ;;  %1150 = vmatpush1.bf16.msra.mxu1 %v3071_v52  ;;  %v3152_v51 = vld [vmem:[#allocation5] ss:$16 sps:$4 sm:$0xff]   ;;  %v3155_v52 = vld [vmem:[#allocation5 + $0x8] ss:$16 sps:$4 sm:$0xff]  }
 0x116   :  { %1069 = vmatprep.subr.bf16.mxu0 %v3076_v53  ;;  %1151 = vmatprep.subr.bf16.mxu1 %v3079_v54  ;;  %v230_v53 = vpack.c.bf16 %v226_v49, %v226_v49  ;;  %v3163_v54 = vld [vmem:[#allocation5 + $0x2c] ss:$16 sps:$4 sm:$0xff]   ;;  %v3236_v49 = vld [vmem:[#allocation5 + $0x1c0] ss:$16 sps:$4 sm:$0xff]  }
 0x119   :  { %1070 = vmatpush1.bf16.msra.mxu0 %v3074_v55  ;;  %1152 = vmatpush1.bf16.msra.mxu1 %v3077_v56  ;;  %v3158_v55 = vld [vmem:[#allocation5 + $0x20] ss:$16 sps:$4 sm:$0xff]   ;;  %v3161_v56 = vld [vmem:[#allocation5 + $0x28] ss:$16 sps:$4 sm:$0xff]  }
 0x11a   :  { %1071 = vmatprep.subr.bf16.mxu0 %v3082_v57  ;;  %1153 = vmatprep.subr.bf16.mxu1 %v3085_v58  ;;  %v3166_v57 = vld [vmem:[#allocation5 + $0x44] ss:$16 sps:$4 sm:$0xff]   ;;  %v3169_v58 = vld [vmem:[#allocation5 + $0x4c] ss:$16 sps:$4 sm:$0xff]  }
 0x11d   :  { %1072 = vmatpush1.bf16.msra.mxu0 %v3080_v59  ;;  %1154 = vmatpush1.bf16.msra.mxu1 %v3083_v60  ;;  %v3164_v59 = vld [vmem:[#allocation5 + $0x40] ss:$16 sps:$4 sm:$0xff]   ;;  %v3167_v60 = vld [vmem:[#allocation5 + $0x48] ss:$16 sps:$4 sm:$0xff]  }
 0x11e   :  { %1073 = vmatprep.subr.bf16.mxu0 %v3088_v61  ;;  %1155 = vmatprep.subr.bf16.mxu1 %v3091_v62  ;;  %v3172_v61 = vld [vmem:[#allocation5 + $0x64] ss:$16 sps:$4 sm:$0xff]   ;;  %v3175_v62 = vld [vmem:[#allocation5 + $0x6c] ss:$16 sps:$4 sm:$0xff]  }
 0x121   :  { %1074 = vmatpush1.bf16.msra.mxu0 %v3086_v63  ;;  %1156 = vmatpush1.bf16.msra.mxu1 %v3089_v0  ;;  %v3170_v63 = vld [vmem:[#allocation5 + $0x60] ss:$16 sps:$4 sm:$0xff]   ;;  %v3173_v0 = vld [vmem:[#allocation5 + $0x68] ss:$16 sps:$4 sm:$0xff]  }
 0x122   :  { %1075 = vmatprep.subr.bf16.mxu0 %v3094_v1  ;;  %1157 = vmatprep.subr.bf16.mxu1 %v3097_v2  ;;  %v3178_v1 = vld [vmem:[#allocation5 + $0x84] ss:$16 sps:$4 sm:$0xff]   ;;  %v3181_v2 = vld [vmem:[#allocation5 + $0x8c] ss:$16 sps:$4 sm:$0xff]  }
 0x125   :  { %1076 = vmatpush1.bf16.msra.mxu0 %v3092_v3  ;;  %1158 = vmatpush1.bf16.msra.mxu1 %v3095_v4  ;;  %v3176_v3 = vld [vmem:[#allocation5 + $0x80] ss:$16 sps:$4 sm:$0xff]   ;;  %v3179_v4 = vld [vmem:[#allocation5 + $0x88] ss:$16 sps:$4 sm:$0xff]  }
 0x126   :  { %1077 = vmatprep.subr.bf16.mxu0 %v3100_v5  ;;  %1159 = vmatprep.subr.bf16.mxu1 %v3103_v6  ;;  %v3184_v5 = vld [vmem:[#allocation5 + $0xa4] ss:$16 sps:$4 sm:$0xff]   ;;  %v3187_v6 = vld [vmem:[#allocation5 + $0xac] ss:$16 sps:$4 sm:$0xff]  }
 0x129   :  { %1078 = vmatpush1.bf16.msra.mxu0 %v3098_v7  ;;  %1160 = vmatpush1.bf16.msra.mxu1 %v3101_v8  ;;  %v3182_v7 = vld [vmem:[#allocation5 + $0xa0] ss:$16 sps:$4 sm:$0xff]   ;;  %v3185_v8 = vld [vmem:[#allocation5 + $0xa8] ss:$16 sps:$4 sm:$0xff]  }
 0x12a   :  { %1079 = vmatprep.subr.bf16.mxu0 %v3106_v9  ;;  %1161 = vmatprep.subr.bf16.mxu1 %v3109_v10  ;;  %v3190_v9 = vld [vmem:[#allocation5 + $0xc4] ss:$16 sps:$4 sm:$0xff]   ;;  %v3193_v10 = vld [vmem:[#allocation5 + $0xcc] ss:$16 sps:$4 sm:$0xff]  }
 0x12d   :  { %1080 = vmatpush1.bf16.msra.mxu0 %v3104_v11  ;;  %1162 = vmatpush1.bf16.msra.mxu1 %v3107_v12  ;;  %v3188_v11 = vld [vmem:[#allocation5 + $0xc0] ss:$16 sps:$4 sm:$0xff]   ;;  %v3191_v12 = vld [vmem:[#allocation5 + $0xc8] ss:$16 sps:$4 sm:$0xff]  }
 0x12e   :  { %1081 = vmatprep.subr.bf16.mxu0 %v3112_v13  ;;  %1163 = vmatprep.subr.bf16.mxu1 %v3115_v14  ;;  %v3196_v13 = vld [vmem:[#allocation5 + $0xe4] ss:$16 sps:$4 sm:$0xff]   ;;  %v3199_v14 = vld [vmem:[#allocation5 + $0xec] ss:$16 sps:$4 sm:$0xff]  }
 0x131   :  { %1082 = vmatpush1.bf16.msra.mxu0 %v3110_v15  ;;  %1164 = vmatpush1.bf16.msra.mxu1 %v3113_v16  ;;  %v3194_v15 = vld [vmem:[#allocation5 + $0xe0] ss:$16 sps:$4 sm:$0xff]   ;;  %v3197_v16 = vld [vmem:[#allocation5 + $0xe8] ss:$16 sps:$4 sm:$0xff]  }
 0x132   :  { %1083 = vmatprep.subr.bf16.mxu0 %v3118_v17  ;;  %1165 = vmatprep.subr.bf16.mxu1 %v3121_v23  ;;  %v3202_v17 = vld [vmem:[#allocation5 + $0x104] ss:$16 sps:$4 sm:$0xff]   ;;  %v3205_v23 = vld [vmem:[#allocation5 + $0x10c] ss:$16 sps:$4 sm:$0xff]  }
 0x135   :  { %1084 = vmatpush1.bf16.msra.mxu0 %v3116_v24  ;;  %1166 = vmatpush1.bf16.msra.mxu1 %v3119_v25  ;;  %v3200_v24 = vld [vmem:[#allocation5 + $0x100] ss:$16 sps:$4 sm:$0xff]   ;;  %v3203_v25 = vld [vmem:[#allocation5 + $0x108] ss:$16 sps:$4 sm:$0xff]  }
 0x136   :  { %1085 = vmatprep.subr.bf16.mxu0 %v3124_v26  ;;  %1167 = vmatprep.subr.bf16.mxu1 %v3127_v27  ;;  %v3208_v26 = vld [vmem:[#allocation5 + $0x124] ss:$16 sps:$4 sm:$0xff]   ;;  %v3211_v27 = vld [vmem:[#allocation5 + $0x12c] ss:$16 sps:$4 sm:$0xff]  }
 0x139   :  { %1086 = vmatpush1.bf16.msra.mxu0 %v3122_v28  ;;  %1168 = vmatpush1.bf16.msra.mxu1 %v3125_v29  ;;  %v3206_v28 = vld [vmem:[#allocation5 + $0x120] ss:$16 sps:$4 sm:$0xff]   ;;  %v3209_v29 = vld [vmem:[#allocation5 + $0x128] ss:$16 sps:$4 sm:$0xff]  }
 0x13a   :  { %1087 = vmatprep.subr.bf16.mxu0 %v3130_v30  ;;  %1169 = vmatprep.subr.bf16.mxu1 %v3133_v32  ;;  %v3214_v30 = vld [vmem:[#allocation5 + $0x144] ss:$16 sps:$4 sm:$0xff]   ;;  %v3217_v32 = vld [vmem:[#allocation5 + $0x14c] ss:$16 sps:$4 sm:$0xff]  }
 0x13d   :  { %1088 = vmatpush1.bf16.msra.mxu0 %v3128_v33  ;;  %1170 = vmatpush1.bf16.msra.mxu1 %v3131_v34  ;;  %v3212_v33 = vld [vmem:[#allocation5 + $0x140] ss:$16 sps:$4 sm:$0xff]   ;;  %v3215_v34 = vld [vmem:[#allocation5 + $0x148] ss:$16 sps:$4 sm:$0xff]  }
 0x13e   :  { %1089 = vmatprep.subr.bf16.mxu0 %v3136_v36  ;;  %1171 = vmatprep.subr.bf16.mxu1 %v3139_v37  ;;  %v3220_v36 = vld [vmem:[#allocation5 + $0x164] ss:$16 sps:$4 sm:$0xff]   ;;  %v3223_v37 = vld [vmem:[#allocation5 + $0x16c] ss:$16 sps:$4 sm:$0xff]  }
 0x141   :  { %1090 = vmatpush1.bf16.msra.mxu0 %v3134_v38  ;;  %1172 = vmatpush1.bf16.msra.mxu1 %v3137_v39  ;;  %v3218_v38 = vld [vmem:[#allocation5 + $0x160] ss:$16 sps:$4 sm:$0xff]   ;;  %v3221_v39 = vld [vmem:[#allocation5 + $0x168] ss:$16 sps:$4 sm:$0xff]  }
 0x142   :  { %1091 = vmatprep.subr.bf16.mxu0 %v3142_v41  ;;  %1173 = vmatprep.subr.bf16.mxu1 %v3145_v42  ;;  %v3229_v41 = vld [vmem:[#allocation5 + $0x18c] ss:$16 sps:$4 sm:$0xff]   ;;  %v3224_v42 = vld [vmem:[#allocation5 + $0x180] ss:$16 sps:$4 sm:$0xff]  }
 0x145   :  { %1092 = vmatpush1.bf16.msra.mxu0 %v3140_v43  ;;  %1174 = vmatpush1.bf16.msra.mxu1 %v3143_v44  ;;  %v3227_v43 = vld [vmem:[#allocation5 + $0x188] ss:$16 sps:$4 sm:$0xff]   ;;  %v3232_v44 = vld [vmem:[#allocation5 + $0x1a4] ss:$16 sps:$4 sm:$0xff]  }
 0x146   :  { %1093 = vmatprep.subr.bf16.mxu0 %v3148_v45  ;;  %1175 = vmatprep.subr.bf16.mxu1 %v3151_v46  ;;  %v3230_v45 = vld [vmem:[#allocation5 + $0x1a0] ss:$16 sps:$4 sm:$0xff]   ;;  %v3233_v46 = vld [vmem:[#allocation5 + $0x1a8] ss:$16 sps:$4 sm:$0xff]  }
 0x149   :  { %1094 = vmatpush1.bf16.msra.mxu0 %v3146_v47  ;;  %1176 = vmatpush1.bf16.msra.mxu1 %v3149_v48  ;;  %v3238_v47 = vld [vmem:[#allocation5 + $0x1c4] ss:$16 sps:$4 sm:$0xff]   ;;  %v3241_v48 = vld [vmem:[#allocation5 + $0x1cc] ss:$16 sps:$4 sm:$0xff]  }
 0x14a   :  { %1984 = vmatprep.subr.bf16.mxu0 %v3154_v20  ;;  %2066 = vmatprep.subr.bf16.mxu1 %v3157_v50  ;;  %v3239_v20 = vld [vmem:[#allocation5 + $0x1c8] ss:$16 sps:$4 sm:$0xff]   ;;  %v3244_v50 = vld [vmem:[#allocation5 + $0x1e4] ss:$16 sps:$4 sm:$0xff]  }
 0x14c   :  { %1096 = vmatmul.mubr.bf16.vlgmr.msra.gmra.mrb[4].mxu0 %v230_v53  ;;  %1178 = vmatmul.mubr.bf16.vlgmr.msra.gmra.mrb[4].mxu1 %v230_v53  ;;  %v3245_v53 = vld [vmem:[#allocation5 + $0x1e8] ss:$16 sps:$4 sm:$0xff]  }
 0x14d   :  { %1985 = vmatpush1.bf16.msra.mxu0 %v3152_v51  ;;  %2067 = vmatpush1.bf16.msra.mxu1 %v3155_v52  ;;  %v3247_v51 = vld [vmem:[#allocation5 + $0x1ec] ss:$16 sps:$4 sm:$0xff]   ;;  %v3242_v52 = vld [vmem:[#allocation5 + $0x1e0] ss:$16 sps:$4 sm:$0xff]  }
 0x14e   :  { %1986 = vmatprep.subr.bf16.mxu0 %v3160_v31  ;;  %2068 = vmatprep.subr.bf16.mxu1 %v3163_v54  ;;  %v3250_v31 = vld [vmem:[#allocation5 + $0x204] ss:$16 sps:$4 sm:$0xff]   ;;  %v3253_v54 = vld [vmem:[#allocation5 + $0x20c] ss:$16 sps:$4 sm:$0xff]  }
 0x151   :  { %1987 = vmatpush1.bf16.msra.mxu0 %v3158_v55  ;;  %2069 = vmatpush1.bf16.msra.mxu1 %v3161_v56  ;;  %v3607_v55 = vld [vmem:[%s3752_s4] sm:$0xf] }
 0x152   :  { %1988 = vmatprep.subr.bf16.mxu0 %v3166_v57  ;;  %2070 = vmatprep.subr.bf16.mxu1 %v3169_v58  ;;  %v365_v56 = vrot.slane %v3607_v55, %v3577_v19  ;;  %v369_v57 = vrot.slane %v3607_v55, %v3585_v21  ;;  %v377_v58 = vrot.slane %v3607_v55, %v3588_v22 }
 0x155   :  { %1989 = vmatpush1.bf16.msra.mxu0 %v3164_v59  ;;  %2071 = vmatpush1.bf16.msra.mxu1 %v3167_v60 }
 0x156   :  { %1990 = vmatprep.subr.bf16.mxu0 %v3172_v61  ;;  %2072 = vmatprep.subr.bf16.mxu1 %v3175_v62 }
 0x159   :  { %1991 = vmatpush1.bf16.msra.mxu0 %v3170_v63  ;;  %2073 = vmatpush1.bf16.msra.mxu1 %v3173_v0 }
 0x15a   :  { %1992 = vmatprep.subr.bf16.mxu0 %v3178_v1  ;;  %2074 = vmatprep.subr.bf16.mxu1 %v3181_v2 }
 0x15d   :  { %1993 = vmatpush1.bf16.msra.mxu0 %v3176_v3  ;;  %2075 = vmatpush1.bf16.msra.mxu1 %v3179_v4 }
 0x15e   :  { %1994 = vmatprep.subr.bf16.mxu0 %v3184_v5  ;;  %2076 = vmatprep.subr.bf16.mxu1 %v3187_v6 }
 0x161   :  { %1995 = vmatpush1.bf16.msra.mxu0 %v3182_v7  ;;  %2077 = vmatpush1.bf16.msra.mxu1 %v3185_v8 }
 0x162   :  { %1996 = vmatprep.subr.bf16.mxu0 %v3190_v9  ;;  %2078 = vmatprep.subr.bf16.mxu1 %v3193_v10  ;;  %v3248_v10 = vld [vmem:[#allocation5 + $0x200] ss:$16 sps:$4 sm:$0xff]  }
 0x165   :  { %1997 = vmatpush1.bf16.msra.mxu0 %v3188_v11  ;;  %2079 = vmatpush1.bf16.msra.mxu1 %v3191_v12  ;;  %v3251_v11 = vld [vmem:[#allocation5 + $0x208] ss:$16 sps:$4 sm:$0xff]  }
 0x166   :  { %1998 = vmatprep.subr.bf16.mxu0 %v3196_v13  ;;  %2080 = vmatprep.subr.bf16.mxu1 %v3199_v14  ;;  %v3256_v13 = vld [vmem:[#allocation5 + $0x224] ss:$16 sps:$4 sm:$0xff]   ;;  %v3259_v14 = vld [vmem:[#allocation5 + $0x22c] ss:$16 sps:$4 sm:$0xff]  }
 0x169   :  { %1999 = vmatpush1.bf16.msra.mxu0 %v3194_v15  ;;  %2081 = vmatpush1.bf16.msra.mxu1 %v3197_v16  ;;  %v3254_v16 = vld [vmem:[#allocation5 + $0x220] ss:$16 sps:$4 sm:$0xff]  }
 0x16a   :  { %2000 = vmatprep.subr.bf16.mxu0 %v3202_v17  ;;  %2082 = vmatprep.subr.bf16.mxu1 %v3205_v23  ;;  %v3257_v17 = vld [vmem:[#allocation5 + $0x228] ss:$16 sps:$4 sm:$0xff]   ;;  %v3262_v23 = vld [vmem:[#allocation5 + $0x244] ss:$16 sps:$4 sm:$0xff]  }
 0x16d   :  { %2001 = vmatpush1.bf16.msra.mxu0 %v3200_v24  ;;  %2083 = vmatpush1.bf16.msra.mxu1 %v3203_v25  ;;  %v3265_v24 = vld [vmem:[#allocation5 + $0x24c] ss:$16 sps:$4 sm:$0xff]   ;;  %v3260_v25 = vld [vmem:[#allocation5 + $0x240] ss:$16 sps:$4 sm:$0xff]  }
 0x16e   :  { %2002 = vmatprep.subr.bf16.mxu0 %v3208_v26  ;;  %2084 = vmatprep.subr.bf16.mxu1 %v3211_v27  ;;  %v3263_v26 = vld [vmem:[#allocation5 + $0x248] ss:$16 sps:$4 sm:$0xff]   ;;  %v3268_v27 = vld [vmem:[#allocation5 + $0x264] ss:$16 sps:$4 sm:$0xff]  }
 0x171   :  { %2003 = vmatpush1.bf16.msra.mxu0 %v3206_v28  ;;  %2085 = vmatpush1.bf16.msra.mxu1 %v3209_v29  ;;  %v3271_v28 = vld [vmem:[#allocation5 + $0x26c] ss:$16 sps:$4 sm:$0xff]   ;;  %v3266_v29 = vld [vmem:[#allocation5 + $0x260] ss:$16 sps:$4 sm:$0xff]  }
 0x172   :  { %2004 = vmatprep.subr.bf16.mxu0 %v3214_v30  ;;  %2086 = vmatprep.subr.bf16.mxu1 %v3217_v32  ;;  %v3269_v30 = vld [vmem:[#allocation5 + $0x268] ss:$16 sps:$4 sm:$0xff]   ;;  %v3274_v32 = vld [vmem:[#allocation5 + $0x284] ss:$16 sps:$4 sm:$0xff]  }
 0x175   :  { %2005 = vmatpush1.bf16.msra.mxu0 %v3212_v33  ;;  %2087 = vmatpush1.bf16.msra.mxu1 %v3215_v34  ;;  %v3277_v33 = vld [vmem:[#allocation5 + $0x28c] ss:$16 sps:$4 sm:$0xff]   ;;  %v3272_v34 = vld [vmem:[#allocation5 + $0x280] ss:$16 sps:$4 sm:$0xff]  }
 0x176   :  { %2006 = vmatprep.subr.bf16.mxu0 %v3220_v36  ;;  %2088 = vmatprep.subr.bf16.mxu1 %v3223_v37  ;;  %v3275_v36 = vld [vmem:[#allocation5 + $0x288] ss:$16 sps:$4 sm:$0xff]   ;;  %v3280_v37 = vld [vmem:[#allocation5 + $0x2a4] ss:$16 sps:$4 sm:$0xff]  }
 0x179   :  { %2007 = vmatpush1.bf16.msra.mxu0 %v3218_v38  ;;  %2089 = vmatpush1.bf16.msra.mxu1 %v3221_v39  ;;  %v3283_v38 = vld [vmem:[#allocation5 + $0x2ac] ss:$16 sps:$4 sm:$0xff]   ;;  %v3278_v39 = vld [vmem:[#allocation5 + $0x2a0] ss:$16 sps:$4 sm:$0xff]  }
 0x17a   :  { %2008 = vmatprep.subr.bf16.mxu0 %v3226_v40  ;;  %2090 = vmatprep.subr.bf16.mxu1 %v3229_v41  ;;  %v3281_v40 = vld [vmem:[#allocation5 + $0x2a8] ss:$16 sps:$4 sm:$0xff]   ;;  %v3286_v41 = vld [vmem:[#allocation5 + $0x2c4] ss:$16 sps:$4 sm:$0xff]  }
 0x17d   :  { %2009 = vmatpush1.bf16.msra.mxu0 %v3224_v42  ;;  %2091 = vmatpush1.bf16.msra.mxu1 %v3227_v43  ;;  %v3289_v42 = vld [vmem:[#allocation5 + $0x2cc] ss:$16 sps:$4 sm:$0xff]   ;;  %v3284_v43 = vld [vmem:[#allocation5 + $0x2c0] ss:$16 sps:$4 sm:$0xff]  }
 0x17e   :  { %2010 = vmatprep.subr.bf16.mxu0 %v3232_v44  ;;  %2092 = vmatprep.subr.bf16.mxu1 %v3235_v18  ;;  %v3287_v44 = vld [vmem:[#allocation5 + $0x2c8] ss:$16 sps:$4 sm:$0xff]   ;;  %v3292_v18 = vld [vmem:[#allocation5 + $0x2e4] ss:$16 sps:$4 sm:$0xff]  }
 0x181   :  { %2011 = vmatpush1.bf16.msra.mxu0 %v3230_v45  ;;  %2093 = vmatpush1.bf16.msra.mxu1 %v3233_v46  ;;  %v3295_v45 = vld [vmem:[#allocation5 + $0x2ec] ss:$16 sps:$4 sm:$0xff]   ;;  %v3290_v46 = vld [vmem:[#allocation5 + $0x2e0] ss:$16 sps:$4 sm:$0xff]  }
 0x182   :  { %2012 = vmatprep.subr.bf16.mxu0 %v3238_v47  ;;  %2094 = vmatprep.subr.bf16.mxu1 %v3241_v48  ;;  %v3293_v47 = vld [vmem:[#allocation5 + $0x2e8] ss:$16 sps:$4 sm:$0xff]   ;;  %v3298_v48 = vld [vmem:[#allocation5 + $0x304] ss:$16 sps:$4 sm:$0xff]  }
 0x185   :  { %2013 = vmatpush1.bf16.msra.mxu0 %v3236_v49  ;;  %2095 = vmatpush1.bf16.msra.mxu1 %v3239_v20  ;;  %v3301_v49 = vld [vmem:[#allocation5 + $0x30c] ss:$16 sps:$4 sm:$0xff]   ;;  %v3296_v20 = vld [vmem:[#allocation5 + $0x300] ss:$16 sps:$4 sm:$0xff]  }
 0x186   :  { %2014 = vmatprep.subr.bf16.mxu0 %v3244_v50  ;;  %2096 = vmatprep.subr.bf16.mxu1 %v3247_v51  ;;  %v3299_v50 = vld [vmem:[#allocation5 + $0x308] ss:$16 sps:$4 sm:$0xff]   ;;  %v3304_v51 = vld [vmem:[#allocation5 + $0x324] ss:$16 sps:$4 sm:$0xff]  }
 0x189   :  { %2015 = vmatpush1.bf16.msra.mxu0 %v3242_v52  ;;  %2097 = vmatpush1.bf16.msra.mxu1 %v3245_v53  ;;  %v3307_v52 = vld [vmem:[#allocation5 + $0x32c] ss:$16 sps:$4 sm:$0xff]   ;;  %v3302_v53 = vld [vmem:[#allocation5 + $0x320] ss:$16 sps:$4 sm:$0xff]  }
 0x18a   :  { %2025 = vmatprep.subr.bf16.mxu0 %v3250_v31  ;;  %2107 = vmatprep.subr.bf16.mxu1 %v3253_v54  ;;  %v3305_v31 = vld [vmem:[#allocation5 + $0x328] ss:$16 sps:$4 sm:$0xff]   ;;  %v3310_v54 = vld [vmem:[#allocation5 + $0x344] ss:$16 sps:$4 sm:$0xff]  }
 0x21f   :  { %v1097_v59 = vpop.f32.mrb[4].mxu0  ;;  %v3615_v60 = vpop.f32.mrb[4].mxu1 }
 0x220   :  { %v2918_v61 = vadd.f32 %v1097_v59, %v365_v56  ;;  %v1099_v62 = vpop.f32.mrb[5].mxu0  ;;  %v1181_v63 = vpop.f32.mrb[5].mxu1  ;;  %v3313_v56 = vld [vmem:[#allocation5 + $0x34c] ss:$16 sps:$4 sm:$0xff]   ;;  %v3316_v59 = vld [vmem:[#allocation5 + $0x364] ss:$16 sps:$4 sm:$0xff]  }
 0x221   :  { %v2919_v0 = vadd.f32 %v1099_v62, %v369_v57  ;;  %v2921_v1 = vadd.f32 %v1181_v63, %v377_v58  ;;  %v1101_v2 = vpop.f32.mrb[6].mxu0  ;;  %v1183_v3 = vpop.f32.mrb[6].mxu1  ;;  %v3308_v57 = vld [vmem:[#allocation5 + $0x340] ss:$16 sps:$4 sm:$0xff]   ;;  %v3311_v58 = vld [vmem:[#allocation5 + $0x348] ss:$16 sps:$4 sm:$0xff]  }
 0x222   :  { %v1186_v4 = vmax.f32 %v2918_v61, 0.0  ;;  %v1102_v5 = vpop.f32.mrb[7].mxu0  ;;  %v1184_v6 = vpop.f32.mrb[7].mxu1  ;;  %v3319_v61 = vld [vmem:[#allocation5 + $0x36c] ss:$16 sps:$4 sm:$0xff]  }
 0x223   :  { %v1187_v7 = vmax.f32 %v2919_v0, 0.0  ;;  %v1189_v8 = vmax.f32 %v2921_v1, 0.0  ;;  %v3314_v62 = vld [vmem:[#allocation5 + $0x360] ss:$16 sps:$4 sm:$0xff]   ;;  %v3317_v63 = vld [vmem:[#allocation5 + $0x368] ss:$16 sps:$4 sm:$0xff]  }
 0x224   :  { %v1190_v12 = vpack.c.bf16 %v1186_v4, %v1186_v4  ;;  %v3322_v0 = vld [vmem:[#allocation5 + $0x384] ss:$16 sps:$4 sm:$0xff]   ;;  %v3325_v1 = vld [vmem:[#allocation5 + $0x38c] ss:$16 sps:$4 sm:$0xff]   ;;  %v3320_v2 = vld [vmem:[#allocation5 + $0x380] ss:$16 sps:$4 sm:$0xff]  }
 0x225   :  { %v1191_v9 = vpack.c.bf16 %v1187_v7, %v1187_v7  ;;  %v1193_v15 = vpack.c.bf16 %v1189_v8, %v1189_v8  ;;  %v3323_v3 = vld [vmem:[#allocation5 + $0x388] ss:$16 sps:$4 sm:$0xff]   ;;  %v3328_v4 = vld [vmem:[#allocation5 + $0x3a4] ss:$16 sps:$4 sm:$0xff]   ;;  %v3331_v5 = vld [vmem:[#allocation5 + $0x3ac] ss:$16 sps:$4 sm:$0xff]   ;;  %v373_v8 = vrot.slane %v3607_v55, %v3599_v35 }
 0x226   :  { %v3326_v6 = vld [vmem:[#allocation5 + $0x3a0] ss:$16 sps:$4 sm:$0xff]   ;;  %v3329_v7 = vld [vmem:[#allocation5 + $0x3a8] ss:$16 sps:$4 sm:$0xff]  }
 0x227   :  { %2016 = vmatprep.mubr.bf16.mxu0 %v1191_v9  ;;  %2098 = vmatprep.mubr.bf16.mxu1 %v1191_v9  ;;  %v3334_v9 = vld [vmem:[#allocation5 + $0x3c4] ss:$16 sps:$4 sm:$0xff]  }
 0x228   :  { %2017 = vmatmul.mubr.bf16.vlgmr.msra.gmra.mrb[8].mxu0 %v1190_v12  ;;  %2099 = vmatmul.mubr.bf16.vlgmr.msra.gmra.mrb[8].mxu1 %v1190_v12  ;;  %v3335_v12 = vld [vmem:[#allocation5 + $0x3c8] ss:$16 sps:$4 sm:$0xff]   ;;  %v3344_v55 = vld [vmem:[%s3755_s7 + $0x40] sm:$0xff]  }
 0x229   :  { %2026 = vmatpush1.bf16.msra.mxu0 %v3248_v10  ;;  %2108 = vmatpush1.bf16.msra.mxu1 %v3251_v11  ;;  %v3337_v10 = vld [vmem:[#allocation5 + $0x3cc] ss:$16 sps:$4 sm:$0xff]   ;;  %v3332_v11 = vld [vmem:[#allocation5 + $0x3c0] ss:$16 sps:$4 sm:$0xff]  }
 0x22a   :  { %2057 = vmatprep.mubr.bf16.mxu0 %v1193_v15  ;;  %2139 = vmatprep.mubr.bf16.mxu1 %v1193_v15  ;;  %v3343_v15 = vld [vmem:[#allocation5 + $0x3ec] ss:$16 sps:$4 sm:$0xff]  }
 0x22b   :  { %2027 = vmatprep.subr.bf16.mxu0 %v3256_v13  ;;  %2109 = vmatprep.subr.bf16.mxu1 %v3259_v14  ;;  %v2920_v13 = vadd.f32 %v3615_v60, %v373_v8  ;;  %v3340_v14 = vld [vmem:[#allocation5 + $0x3e4] ss:$16 sps:$4 sm:$0xff]  }
 0x22c   :  { %v3346_v60 = vld [vmem:[%s3755_s7] sm:$0xff]  }
 0x22d   :  { %2028 = vmatpush1.bf16.msra.mxu0 %v3254_v16  ;;  %2110 = vmatpush1.bf16.msra.mxu1 %v3257_v17  ;;  %v3338_v16 = vld [vmem:[#allocation5 + $0x3e0] ss:$16 sps:$4 sm:$0xff]   ;;  %v3341_v17 = vld [vmem:[#allocation5 + $0x3e8] ss:$16 sps:$4 sm:$0xff]  }
 0x22e   :  { %2029 = vmatprep.subr.bf16.mxu0 %v3262_v23  ;;  %2111 = vmatprep.subr.bf16.mxu1 %v3265_v24  ;;  %v1188_v23 = vmax.f32 %v2920_v13, 0.0  ;;  %v3345_v24 = vld [vmem:[%s3755_s7 + $0xc0] sm:$0xff]  }
 0x231   :  { %2030 = vmatpush1.bf16.msra.mxu0 %v3260_v25  ;;  %2112 = vmatpush1.bf16.msra.mxu1 %v3263_v26  ;;  %v3347_v25 = vld [vmem:[%s3755_s7 + $0x80] sm:$0xff]   ;;  %v1192_v26 = vpack.c.bf16 %v1188_v23, %v1188_v23 }
 0x232   :  { %2031 = vmatprep.subr.bf16.mxu0 %v3268_v27  ;;  %2113 = vmatprep.subr.bf16.mxu1 %v3271_v28  ;;  %v3348_v27 = vld [vmem:[%s3755_s7 + $0x48] sm:$0xff]  }
 0x233   :  { %v3349_v28 = vld [vmem:[%s3755_s7 + $0xc8] sm:$0xff]  }
 0x235   :  { %2032 = vmatpush1.bf16.msra.mxu0 %v3266_v29  ;;  %2114 = vmatpush1.bf16.msra.mxu1 %v3269_v30  ;;  %v3350_v29 = vld [vmem:[%s3755_s7 + $0x8] sm:$0xff]  }
 0x236   :  { %2033 = vmatprep.subr.bf16.mxu0 %v3274_v32  ;;  %2115 = vmatprep.subr.bf16.mxu1 %v3277_v33  ;;  %v3351_v30 = vld [vmem:[%s3755_s7 + $0x88] sm:$0xff]   ;;  %v3352_v32 = vld [vmem:[%s3755_s7 + $0x50] sm:$0xff]  }
 0x237   :  { %v3353_v33 = vld [vmem:[%s3755_s7 + $0xd0] sm:$0xff]  }
 0x239   :  { %2034 = vmatpush1.bf16.msra.mxu0 %v3272_v34  ;;  %2116 = vmatpush1.bf16.msra.mxu1 %v3275_v36  ;;  %v3354_v34 = vld [vmem:[%s3755_s7 + $0x10] sm:$0xff]  }
 0x23a   :  { %2035 = vmatprep.subr.bf16.mxu0 %v3280_v37  ;;  %2117 = vmatprep.subr.bf16.mxu1 %v3283_v38  ;;  %v3355_v36 = vld [vmem:[%s3755_s7 + $0x90] sm:$0xff]   ;;  %v3356_v37 = vld [vmem:[%s3755_s7 + $0x58] sm:$0xff]  }
 0x23b   :  { %v3357_v38 = vld [vmem:[%s3755_s7 + $0xd8] sm:$0xff]  }
 0x23d   :  { %2036 = vmatpush1.bf16.msra.mxu0 %v3278_v39  ;;  %2118 = vmatpush1.bf16.msra.mxu1 %v3281_v40  ;;  %v3358_v39 = vld [vmem:[%s3755_s7 + $0x18] sm:$0xff]  }
 0x23e   :  { %2037 = vmatprep.subr.bf16.mxu0 %v3286_v41  ;;  %2119 = vmatprep.subr.bf16.mxu1 %v3289_v42  ;;  %v3359_v40 = vld [vmem:[%s3755_s7 + $0x98] sm:$0xff]   ;;  %v3360_v41 = vld [vmem:[%s3755_s7 + $0x60] sm:$0xff]  }
 0x23f   :  { %v3361_v42 = vld [vmem:[%s3755_s7 + $0xe0] sm:$0xff]  }
 0x241   :  { %2038 = vmatpush1.bf16.msra.mxu0 %v3284_v43  ;;  %2120 = vmatpush1.bf16.msra.mxu1 %v3287_v44  ;;  %v3362_v43 = vld [vmem:[%s3755_s7 + $0x20] sm:$0xff]  }
 0x242   :  { %2039 = vmatprep.subr.bf16.mxu0 %v3292_v18  ;;  %2121 = vmatprep.subr.bf16.mxu1 %v3295_v45  ;;  %v3363_v44 = vld [vmem:[%s3755_s7 + $0xa0] sm:$0xff]   ;;  %v3364_v18 = vld [vmem:[%s3755_s7 + $0x68] sm:$0xff]  }
 0x243   :  { %v3365_v45 = vld [vmem:[%s3755_s7 + $0xe8] sm:$0xff]  }
 0x245   :  { %2040 = vmatpush1.bf16.msra.mxu0 %v3290_v46  ;;  %2122 = vmatpush1.bf16.msra.mxu1 %v3293_v47  ;;  %v3366_v46 = vld [vmem:[%s3755_s7 + $0x28] sm:$0xff]  }
 0x246   :  { %2041 = vmatprep.subr.bf16.mxu0 %v3298_v48  ;;  %2123 = vmatprep.subr.bf16.mxu1 %v3301_v49  ;;  %v3367_v47 = vld [vmem:[%s3755_s7 + $0xa8] sm:$0xff]   ;;  %v3368_v48 = vld [vmem:[%s3755_s7 + $0x70] sm:$0xff]  }
 0x247   :  { %v3369_v49 = vld [vmem:[%s3755_s7 + $0xf0] sm:$0xff]  }
 0x249   :  { %2042 = vmatpush1.bf16.msra.mxu0 %v3296_v20  ;;  %2124 = vmatpush1.bf16.msra.mxu1 %v3299_v50  ;;  %v3370_v20 = vld [vmem:[%s3755_s7 + $0x30] sm:$0xff]  }
 0x24a   :  { %2043 = vmatprep.subr.bf16.mxu0 %v3304_v51  ;;  %2125 = vmatprep.subr.bf16.mxu1 %v3307_v52  ;;  %v3371_v50 = vld [vmem:[%s3755_s7 + $0xb0] sm:$0xff]   ;;  %v3372_v51 = vld [vmem:[%s3755_s7 + $0x78] sm:$0xff]  }
 0x24b   :  { %v3373_v52 = vld [vmem:[%s3755_s7 + $0xf8] sm:$0xff]  }
 0x24d   :  { %2044 = vmatpush1.bf16.msra.mxu0 %v3302_v53  ;;  %2126 = vmatpush1.bf16.msra.mxu1 %v3305_v31  ;;  %v3374_v53 = vld [vmem:[%s3755_s7 + $0x38] sm:$0xff]  }
 0x24e   :  { %2045 = vmatprep.subr.bf16.mxu0 %v3310_v54  ;;  %2127 = vmatprep.subr.bf16.mxu1 %v3313_v56  ;;  %v3375_v31 = vld [vmem:[%s3755_s7 + $0xb8] sm:$0xff]   ;;  %v3719_v54 = vld [vmem:[%s3757_s9] sm:$0xff]  ;;  %s3469_s9 = smov [#allocation7]  }
 0x24f   :  { %2509 = vrot.lane.b32.xlu0 %v3719_v54, %s3467_s5  ;;  %v1322_v56 = vld [vmem:[%s3754_s6] sm:$0xf]  ;;  %s2562_s26 = sshll.u32 %s3469_s9, 4  ;;  %s2563_s26 = int_to_ptr.vmem [resolvable:$true] %s2562_s26 }
 0x250   :  { %s3434_s27 = scalar_lea.vmem %s2563_s26, 128  ;;  %p3439_p3 = scmp.lt.s32.totalorder %s2563_s26, %s2563_s26 }
 0x251   :  { %2046 = vmatpush1.bf16.msra.mxu0 %v3308_v57  ;;  %2128 = vmatpush1.bf16.msra.mxu1 %v3311_v58  ;;  %v1327_v57 = vrot.slane %v1322_v56, %v3577_v19  ;;  %v1335_v58 = vrot.slane %v1322_v56, %v3599_v35  ;;  %p3435_p2 = scmp.ne.s32.totalorder %s2563_s26, %s3434_s27  ;;  %p3440_p4 = scmp.lt.s32.totalorder %s3434_s27, %s3434_s27 }
 0x252   :  { %2047 = vmatprep.subr.bf16.mxu0 %v3316_v59  ;;  %2129 = vmatprep.subr.bf16.mxu1 %v3319_v61  ;;  %v1331_v59 = vrot.slane %v1322_v56, %v3585_v21  ;;  %v1339_v61 = vrot.slane %v1322_v56, %v3588_v22 }
 0x253   :  { %p3441_p5 = por %p3440_p4, %p3439_p3 }
 0x255   :  { %2048 = vmatpush1.bf16.msra.mxu0 %v3314_v62  ;;  %2130 = vmatpush1.bf16.msra.mxu1 %v3317_v63  ;;  %p3442_p6 = pnand %p3441_p5, %p3435_p2 }
 0x256   :  { %2049 = vmatprep.subr.bf16.mxu0 %v3322_v0  ;;  %2131 = vmatprep.subr.bf16.mxu1 %v3325_v1 }
 0x259   :  { %2050 = vmatpush1.bf16.msra.mxu0 %v3320_v2  ;;  %2132 = vmatpush1.bf16.msra.mxu1 %v3323_v3 }
 0x25a   :  { %2051 = vmatprep.subr.bf16.mxu0 %v3328_v4  ;;  %2133 = vmatprep.subr.bf16.mxu1 %v3331_v5 }
 0x25d   :  { %2052 = vmatpush1.bf16.msra.mxu0 %v3326_v6  ;;  %2134 = vmatpush1.bf16.msra.mxu1 %v3329_v7 }
 0x25e   :  { %2053 = vmatprep.subr.bf16.mxu0 %v3334_v9  ;;  %2135 = vmatprep.subr.bf16.mxu1 %v3337_v10 }
 0x261   :  { %2054 = vmatpush1.bf16.msra.mxu0 %v3332_v11  ;;  %2136 = vmatpush1.bf16.msra.mxu1 %v3335_v12 }
 0x262   :  { %2055 = vmatprep.subr.bf16.mxu0 %v3340_v14  ;;  %2137 = vmatprep.subr.bf16.mxu1 %v3343_v15 }
 0x265   :  { %2056 = vmatpush1.bf16.msra.mxu0 %v3338_v16  ;;  %2138 = vmatpush1.bf16.msra.mxu1 %v3341_v17  ;;  %v2840_v16 = vld [vmem:[%s3756_s8] ss:$0 sm:$0xff]  ;;  %s3468_s8 = smov 122  }
 0x266   :  { %2874 = vmatprep.subr.bf16.mxu0 %v3344_v55  ;;  %2896 = vmatprep.subr.bf16.mxu1 %v3345_v24 }
 0x268   :  { %2058 = vmatmul.mubr.bf16.vlgmr.msra.gmra.mrb[8].mxu0 %v1192_v26  ;;  %2140 = vmatmul.mubr.bf16.vlgmr.msra.gmra.mrb[8].mxu1 %v1192_v26 }
 0x269   :  { %2875 = vmatpush3.bf16.msra.mxu0 %v3346_v60  ;;  %2897 = vmatpush3.bf16.msra.mxu1 %v3347_v25 }
 0x26a   :  { %2876 = vmatprep.subr.bf16.mxu0 %v3348_v27  ;;  %2898 = vmatprep.subr.bf16.mxu1 %v3349_v28 }
 0x26d   :  { %2877 = vmatpush3.bf16.msra.mxu0 %v3350_v29  ;;  %2899 = vmatpush3.bf16.msra.mxu1 %v3351_v30 }
 0x26e   :  { %2878 = vmatprep.subr.bf16.mxu0 %v3352_v32  ;;  %2900 = vmatprep.subr.bf16.mxu1 %v3353_v33 }
 0x271   :  { %2879 = vmatpush3.bf16.msra.mxu0 %v3354_v34  ;;  %2901 = vmatpush3.bf16.msra.mxu1 %v3355_v36 }
 0x272   :  { %2880 = vmatprep.subr.bf16.mxu0 %v3356_v37  ;;  %2902 = vmatprep.subr.bf16.mxu1 %v3357_v38 }
 0x275   :  { %2881 = vmatpush3.bf16.msra.mxu0 %v3358_v39  ;;  %2903 = vmatpush3.bf16.msra.mxu1 %v3359_v40 }
 0x276   :  { %2882 = vmatprep.subr.bf16.mxu0 %v3360_v41  ;;  %2904 = vmatprep.subr.bf16.mxu1 %v3361_v42 }
 0x279   :  { %2883 = vmatpush3.bf16.msra.mxu0 %v3362_v43  ;;  %2905 = vmatpush3.bf16.msra.mxu1 %v3363_v44 }
 0x27a   :  { %2884 = vmatprep.subr.bf16.mxu0 %v3364_v18  ;;  %2906 = vmatprep.subr.bf16.mxu1 %v3365_v45 }
 0x27d   :  { %2885 = vmatpush3.bf16.msra.mxu0 %v3366_v46  ;;  %2907 = vmatpush3.bf16.msra.mxu1 %v3367_v47 }
 0x27e   :  { %2886 = vmatprep.subr.bf16.mxu0 %v3368_v48  ;;  %2908 = vmatprep.subr.bf16.mxu1 %v3369_v49 }
 0x281   :  { %2887 = vmatpush3.bf16.msra.mxu0 %v3370_v20  ;;  %2909 = vmatpush3.bf16.msra.mxu1 %v3371_v50 }
 0x282   :  { %2888 = vmatprep.subr.bf16.mxu0 %v3372_v51  ;;  %2910 = vmatprep.subr.bf16.mxu1 %v3373_v52  ;;  %v2518_v52 = vmul.f32 %v3719_v54, %v3719_v54 }
 0x285   :  { %2889 = vmatpush3.bf16.msra.mxu0 %v3374_v53  ;;  %2911 = vmatpush3.bf16.msra.mxu1 %v3375_v31 }
 0x2c1   :  { %v2510_v38 = vpop.permute.xlu0 %2509 }
 0x33b   :  { %v2059_v62 = vpop.f32.mrb[8].mxu0  ;;  %v2141_v63 = vpop.f32.mrb[8].mxu1 }
 0x33c   :  { %v2922_v0 = vadd.f32 %v2059_v62, %v1327_v57  ;;  %v2924_v1 = vadd.f32 %v2141_v63, %v1335_v58  ;;  %v2061_v2 = vpop.f32.mrb[9].mxu0  ;;  %v2143_v3 = vpop.f32.mrb[9].mxu1  ;;  %v2519_v57 = vmul.f32 -0.5, %v2518_v52 }
 0x33d   :  { %v2923_v4 = vadd.f32 %v2061_v2, %v1331_v59  ;;  %v2925_v5 = vadd.f32 %v2143_v3, %v1339_v61  ;;  %v2063_v6 = vpop.f32.mrb[10].mxu0  ;;  %v2145_v7 = vpop.f32.mrb[10].mxu1 }
 0x33e   :  { %v2148_v8 = vmax.f32 %v2922_v0, 0.0  ;;  %v2150_v9 = vmax.f32 %v2924_v1, 0.0  ;;  %v2064_v10 = vpop.f32.mrb[11].mxu0  ;;  %v2146_v19 = vpop.f32.mrb[11].mxu1 }
 0x33f   :  { %v2149_v11 = vmax.f32 %v2923_v4, 0.0  ;;  %v2151_v35 = vmax.f32 %v2925_v5, 0.0 }
 0x340   :  { %v2152_v13 = vpack.c.bf16 %v2148_v8, %v2148_v8  ;;  %v2154_v22 = vpack.c.bf16 %v2150_v9, %v2150_v9 }
 0x341   :  { %v2153_v12 = vpack.c.bf16 %v2149_v11, %v2149_v11  ;;  %v2155_v21 = vpack.c.bf16 %v2151_v35, %v2151_v35 }
 0x343   :  { %2451 = vmatprep.mubr.bf16.mxu0 %v2153_v12  ;;  %2491 = vmatprep.mubr.bf16.mxu1 %v2155_v21 }
 0x344   :  { %2452 = vmatmul.mubr.bf16.vlgmr.msra.gmra.mrb[12].mxu0 %v2152_v13  ;;  %2492 = vmatmul.mubr.bf16.vlgmr.msra.gmra.mrb[12].mxu1 %v2154_v22 }
 0x417   :  { %v2890_v14 = vpop.f32.mrb[12].mxu0  ;;  %v2912_v15 = vpop.f32.mrb[12].mxu1 }
 0x418   :  { %v2891_v17 = vpop.f32.mrb[13].mxu0  ;;  %v2913_v23 = vpop.f32.mrb[13].mxu1 }
 0x419   :  { %v2892_v55 = vadd.f32 %v2891_v17, %v2890_v14  ;;  %v2914_v24 = vadd.f32 %v2913_v23, %v2912_v15  ;;  %v2893_v60 = vpop.f32.mrb[14].mxu0  ;;  %v2915_v25 = vpop.f32.mrb[14].mxu1 }
 0x41a   :  { %v2894_v26 = vpop.f32.mrb[15].mxu0  ;;  %v2916_v27 = vpop.f32.mrb[15].mxu1 }
 0x41b   :  { %v2454_v28 = vadd.f32 %v2892_v55, %v2840_v16 }
 0x41d   :  { %v2494_v29 = vadd.f32 %v2914_v24, %v2454_v28 }
 0x41f   :  { %v2500_v30 = vsub.f32 0.0, %v2494_v29 }
 0x421   :  { %v2501_v32 = vmul.f32 1.442695, %v2500_v30 }
 0x423   :  { %3376 = vpow2.f32 %v2501_v32 }
 0x42d   :  { %v3377_v33 = vpop.eup %3376 }
 0x42e   :  { %v2503_v34 = vadd.f32 1.0, %v3377_v33 }
 0x430   :  { %3378 = vrcp.f32 %v2503_v34 }
 0x43a   :  { %v3379_v36 = vpop.eup %3378 }
 0x43b   :  { %v2505_v37 = vmul.f32 0.9, %v3379_v36 }
 0x43d   :  { %v2506_v39 = vadd.f32 0.1, %v2505_v37 }
 0x43f   :  { %v2512_v40 = vmul.f32 %v2510_v38, %v2506_v39  ;;  %3380 = vlog2.f32 %v2506_v39 }
 0x440   :  { %3382 = vtanh.f32 %v2494_v29 }
 0x441   :  { %2514 = vrot.lane.b32.xlu0 %v2512_v40, %s3468_s8 }
 0x449   :  { %v3381_v41 = vpop.eup %3380 }
 0x44a   :  { %v2521_v42 = vmul.f32 0.6931472, %v3381_v41  ;;  %v3383_v43 = vpop.eup %3382 }
 0x44c   :  { %2523 = vrot.lane.b32.xlu1 %v2521_v42, %s3468_s8 }
 0x4b3   :  { %v2515_v44 = vpop.permute.xlu0 %2514 }
 0x4b4   :  { %v2517_v18 = vadd.f32 %v3383_v43, %v2515_v44 }
 0x4b6   :  { %v2529_v45 = vmul.f32 -2.0, %v2517_v18  ;;  %3384 = vtanh.f32 %v2517_v18  ;;  %v2528_v0 = vsub.f32 0.6931472, %v2517_v18 }
 0x4b8   :  { %v2531_v46 = vand.u32 2147483647, %v2529_v45  ;;  %v2530_v62 = vmax.f32 %v2529_v45, 0.0 }
 0x4ba   :  { %v2532_v47 = vsub.f32 0.0, %v2531_v46 }
 0x4bc   :  { %v2533_v48 = vmul.f32 1.442695, %v2532_v47 }
 0x4be   :  { %3386 = vpow2.f32 %v2533_v48  ;;  %v2524_v58 = vpop.permute.xlu1 %2523 }
 0x4bf   :  { %v2526_v1 = vsub.f32 %v2519_v57, %v2524_v58 }
 0x4c0   :  { %v3385_v49 = vpop.eup %3384 }
 0x4c1   :  { %2553 = vst.msk [vmem:[#allocation7] sm:$0xff] %vm2548_vm2, %v3385_v49  ;;  %v2873_v4 = vadd.f32 -0.9189385, %v2526_v1 }
 0x4c8   :  { %v3387_v20 = vpop.eup %3386 }
 0x4c9   :  { %v2535_v50 = vadd.f32 1.0, %v3387_v20  ;;  %v2538_v51 = vmul.f32 -0.5, %v3387_v20  ;;  %v2541_v31 = vand.u32 2147483647, %v3387_v20 }
 0x4cb   :  { %3388 = vlog2.f32 %v2535_v50  ;;  %v2539_v53 = vadd.f32 1.0, %v2538_v51  ;;  %vm2542_vm3 = vcmp.lt.f32.partialorder %v2541_v31, 0.0004427343 }
 0x4cd   :  { %v2540_v61 = vmul.f32 %v3387_v20, %v2539_v53 }
 0x4d5   :  { %v3389_v56 = vpop.eup %3388 }
 0x4d6   :  { %v2537_v59 = vmul.f32 0.6931472, %v3389_v56 }
 0x4d8   :  { %v2543_v63 = vsel %vm2542_vm3, %v2540_v61, %v2537_v59 }
 0x4d9   :  { %v2544_v2 = vadd.f32 %v2543_v63, %v2530_v62 }
 0x4db   :  { %v2545_v3 = vsub.f32 %v2528_v0, %v2544_v2 }
 0x4dd   :  { %v2546_v5 = vmul.f32 2.0, %v2545_v3 }
 0x4df   :  { %v2547_v6 = vsub.f32 %v2873_v4, %v2546_v5 }
 0x4e1   :  { %v2549_v7 = vsel %vm2548_vm2, %v2547_v6, 0.0 }
 0x4e2   :  { %2550 = vadd.xlane.f32.xlu1 %v2549_v7 }
 0x56f   :  { %v2551_v54 = vpop.xlane.xlu1 %2550 }
 0x570   :  { %2555 = vst.msk [vmem:[#allocation7] sm:$0xff] %vm2554_vm4, %v2551_v54 }
 0x571   :  { %3445 = shalt.err (!%p3442_p6)
}
 0x572   :  { %s3446_s30 = scalar_lea.hbm %s3758_s10, 128 }
 0x573   :  { %p3447_p7 = scmp.ne.s32.totalorder %s3758_s10, %s3446_s30  ;;  %p3450_p8 = scmp.lt.u32.totalorder %s3446_s30, %s3758_s10 }
 0x575   :  { %p3452_p9 = pnand %p3450_p8, %p3447_p7 }
 0x577   :  { %3455 = shalt.err (!%p3452_p9)
}
 0x578   :  { %2565 = dma.vmem_to_hbm [thread:$0]  %s2563_s26, 128, %s3758_s10, [#allocation4]  }
 0x579   :  { %3460 = dma.done.wait [#allocation4], 128  }
 0x57a   :  { %3461 = vsyncadd [#allocation4], 4294967168 }
 0x57b   :  { %2569 = vsyncpa [#allocation3], 1 }
 0x57c   :  { %2570 = vsyncpa [#allocation6], 1 }
 0x57d   :  { %2571 = vsyncpa [#allocation4], 1 }

</bundles_post_ra>
